<compile_context>
chip_gen: v7x
topology: tpu7x:2x2x1
jax: 0.10.0
libtpu: 0.0.40
codegen_flags: <defaults>
</compile_context>

<pallas_src>
import functools

import numpy as np
import jax
import jax.numpy as jnp
from jax.experimental import pallas as pl
from jax.experimental.pallas import tpu as pltpu

_SUB = 8                      # sublanes per output tile
_LANE = 128                   # lanes per output tile
_TILE_B = _SUB * _LANE        # 1024 batch elements per grid step


def _fm_linear_gather_kernel(ids_ref, table_ref, bias_ref, out_ref, *, nf, nchunks):
    """Vectorized embedding-sum for output_dim == 1.

    ids_ref   : (1, nf, 8, 128) int32 VMEM  -- offsets already folded in.
    table_ref : (nchunks, 128) float32 VMEM -- lane-packed flat table, resident.
    bias_ref  : (1, 1) float32 SMEM.
    out_ref   : (1, 8, 128) float32         -- batch element b = i*1024 + s*128 + l.
    """
    acc = jnp.full((_SUB, _LANE), bias_ref[0, 0], dtype=jnp.float32)
    tbl = table_ref[...]                                     # (nchunks, 128)
    ids = [ids_ref[0, f] for f in range(nf)]                 # nf x (8, 128) int32
    for c in range(nchunks):                                 # one 128-entry chunk per iter
        row = jnp.broadcast_to(tbl[c:c + 1, :], (_SUB, _LANE))
        base = c * _LANE
        for f in range(nf):
            loc = ids[f] - base
            idx = jnp.clip(loc, 0, _LANE - 1)
            # Lane gather: vals[s, l] = row[s, idx[s, l]]  (128 lookups per vreg).
            vals = jnp.take_along_axis(row, idx, axis=1, mode="promise_in_bounds")
            if nchunks > 1:
                vals = jnp.where((loc >= 0) & (loc < _LANE), vals, 0.0)
            acc = acc + vals
    out_ref[0] = acc


def _fm_linear_select_kernel(ids_ref, table_ref, bias_ref, out_ref, *, nf, vocab):
    """Compatibility fallback (no lax.gather): per-vocab-entry select.

    table_ref : (vocab,) float32 SMEM.  Only meant for small/toy vocabularies.
    """
    acc = jnp.full((_SUB, _LANE), bias_ref[0, 0], dtype=jnp.float32)
    for f in range(nf):
        ids_f = ids_ref[0, f]
        vals = jnp.zeros((_SUB, _LANE), dtype=jnp.float32)
        for v in range(vocab):
            vals = jnp.where(ids_f == v, table_ref[v], vals)
        acc = acc + vals
    out_ref[0] = acc


_VECTOR_GATHER_OK = None   # memo: does this Mosaic build lower the lane gather?


def features_linear(x_idx, offsets, table, bias, *, mode="auto"):
    """FM linear term: sum_f table[x[:, f] + offsets[f]] + bias.

    x_idx: (B, F) int; offsets: (F,) int; table: (V, D) f32; bias: (D,) f32.
    Returns (B, D) float32.
    """
    B, F = x_idx.shape
    V, D = table.shape

    if D != 1:
        # TODO(synk): fuse a real D>1 path (gather (tile*F, D) rows and reduce);
        # for now reuse the tuned D==1 kernel per output column.
        cols = [features_linear(x_idx, offsets, table[:, d:d + 1], bias[d:d + 1], mode=mode)
                for d in range(D)]
        return jnp.concatenate(cols, axis=1)

    # Fold the per-field offsets into the indices (drops one kernel input).
    ids = x_idx.astype(jnp.int32) + offsets.reshape(1, F).astype(jnp.int32)

    # Pad the batch to a multiple of the 1024-element tile; padded rows gather
    # row 0 and are sliced off at the end.
    nb = pl.cdiv(B, _TILE_B)
    bp = nb * _TILE_B
    if bp != B:
        ids = jnp.pad(ids, ((0, bp - B), (0, 0)))
    # (bp, F) -> (nb, F, 8, 128): batch element b = i*1024 + s*128 + l.
    ids_t = ids.reshape(nb, _SUB, _LANE, F).transpose(0, 3, 1, 2)

    # Lane-pack the D==1 table: (V, 1) -> (ceil(V/128), 128) float32.
    nchunks = pl.cdiv(V, _LANE)
    vp = nchunks * _LANE
    tbl_flat = table[:, 0].astype(jnp.float32)
    tbl_packed = jnp.pad(tbl_flat, (0, vp - V)).reshape(nchunks, _LANE)
    bias_arr = bias.reshape(1, 1).astype(jnp.float32)

    out_shape = jax.ShapeDtypeStruct((nb, _SUB, _LANE), jnp.float32)
    out_spec = pl.BlockSpec((1, _SUB, _LANE), lambda i: (i, 0, 0))
    ids_spec = pl.BlockSpec((1, F, _SUB, _LANE), lambda i: (i, 0, 0, 0))
    smem_spec = pl.BlockSpec(memory_space=pltpu.MemorySpace.SMEM)

    # VMEM budget: resident lane-packed table + (double-buffered) ids/out tiles.
    per_step = (F * _SUB * _LANE + _SUB * _LANE) * 4
    resident = tbl_packed.size * 4 + 4
    vmem_limit = int(min(56 << 20, max(16 << 20, 2 * resident + 4 * per_step + (1 << 20))))
    cparams = pltpu.CompilerParams(
        dimension_semantics=("parallel",),
        vmem_limit_bytes=vmem_limit,
    )

    def run_gather():
        kern = functools.partial(_fm_linear_gather_kernel, nf=F, nchunks=nchunks)
        return pl.pallas_call(
            kern,
            out_shape=out_shape,
            grid=(nb,),
            in_specs=[ids_spec,
                      pl.BlockSpec((nchunks, _LANE), lambda i: (0, 0)),  # resident
                      smem_spec],
            out_specs=out_spec,
            compiler_params=cparams,
        )(ids_t, tbl_packed, bias_arr)

    def run_select():
        kern = functools.partial(_fm_linear_select_kernel, nf=F, vocab=V)
        return pl.pallas_call(
            kern,
            out_shape=out_shape,
            grid=(nb,),
            in_specs=[ids_spec, smem_spec, smem_spec],
            out_specs=out_spec,
            compiler_params=cparams,
        )(ids_t, tbl_flat, bias_arr)

    global _VECTOR_GATHER_OK
    if mode == "gather":
        out3 = run_gather()
    elif mode == "select" or _VECTOR_GATHER_OK is False:
        out3 = run_select()
    else:
        try:
            out3 = jax.block_until_ready(run_gather())
            _VECTOR_GATHER_OK = True
        except Exception:   # compatibility guard: no dynamic-gather lowering
            _VECTOR_GATHER_OK = False
            out3 = run_select()

    return out3.reshape(bp, 1)[:B]


def _reference(x_idx, offsets, table, bias):
    ids = x_idx + offsets[None, :]
    return jnp.sum(table[ids], axis=1) + bias[None, :]


if __name__ == "__main__":
    key = jax.random.PRNGKey(0)

    # module config (synthetic, deterministic)
    field_dims = (5, 7, 11, 9)            # sum = 32 rows in the embedding table
    output_dim = 1
    num_fields = len(field_dims)
    vocab = int(sum(field_dims))

    # offsets exactly as in the PyTorch module: (0, *cumsum(field_dims)[:-1])
    offsets = jnp.asarray(np.array((0, *np.cumsum(field_dims)[:-1]), dtype=np.int32))

    k_w, k_x0, k_x1 = jax.random.split(key, 3)
    table = jax.random.normal(k_w, (vocab, output_dim), dtype=jnp.float32) * 0.1
    bias = jnp.full((output_dim,), 0.25, dtype=jnp.float32)   # nonzero so the bias add is exercised

    def make_x(k, batch):
        ks = jax.random.split(k, num_fields)
        cols = [jax.random.randint(ks[f], (batch, 1), 0, field_dims[f], dtype=jnp.int32)
                for f in range(num_fields)]
        return jnp.concatenate(cols, axis=1)          # (batch, num_fields)

    # Small batch (single tile, mostly padding) and a multi-tile, non-multiple
    # batch that exercises the grid, the padding path, and nb >= 2.
    for kx, batch in ((k_x0, 16), (k_x1, 2061)):
        x_idx = make_x(kx, batch)
        out = jax.block_until_ready(features_linear(x_idx, offsets, table, bias))
        ref = _reference(x_idx, offsets, table, bias)
        np.testing.assert_allclose(np.asarray(out), np.asarray(ref), rtol=1e-5, atol=1e-5)

    print("KERNEL_OK")
</pallas_src>

<mosaic_0001>
module attributes {stable_mosaic.version = 11 : i64} {
  func.func @_fm_linear_gather_kernel(%arg0: i32, %arg1: memref<1x4x8x128xi32, #tpu.memory_space<vmem>>, %arg2: memref<1x128xf32, #tpu.memory_space<vmem>>, %arg3: memref<1x1xf32, #tpu.memory_space<smem>>, %arg4: memref<1x8x128xf32, #tpu.memory_space<vmem>>) attributes {dimension_semantics = [#tpu.dimension_semantics<parallel>], iteration_bounds = array<i64: 1>, scalar_prefetch = 0 : i64, scratch_operands = 0 : i64, tpu.core_type = #tpu.core_type<tc>, window_params = [{transform_indices = @transform_0, window_bounds = array<i64: 1, 4, 8, 128>}, {pipeline_mode = #tpu.pipeline_mode<synchronous>, transform_indices = @transform_1, window_bounds = array<i64: 1, 128>}, {transform_indices = @transform_2, window_bounds = array<i64: 1, 1>}, {transform_indices = @transform_3, window_bounds = array<i64: 1, 8, 128>}]} {
    %c0 = arith.constant 0 : index
    %c0_0 = arith.constant 0 : index
    %0 = memref.load %arg3[%c0, %c0_0] : memref<1x1xf32, #tpu.memory_space<smem>>
    %1 = vector.broadcast %0 : f32 to vector<8x128xf32>
    %c0_1 = arith.constant 0 : index
    %c0_2 = arith.constant 0 : index
    %2 = vector.load %arg2[%c0_1, %c0_2] : memref<1x128xf32, #tpu.memory_space<vmem>>, vector<1x128xf32>
    %c0_3 = arith.constant 0 : index
    %c0_4 = arith.constant 0 : index
    %c0_5 = arith.constant 0 : index
    %c0_6 = arith.constant 0 : index
    %3 = vector.load %arg1[%c0_3, %c0_4, %c0_5, %c0_6] : memref<1x4x8x128xi32, #tpu.memory_space<vmem>>, vector<1x1x8x128xi32>
    %4 = vector.shape_cast %3 : vector<1x1x8x128xi32> to vector<8x128xi32>
    %c0_7 = arith.constant 0 : index
    %c1 = arith.constant 1 : index
    %c0_8 = arith.constant 0 : index
    %c0_9 = arith.constant 0 : index
    %5 = vector.load %arg1[%c0_7, %c1, %c0_8, %c0_9] : memref<1x4x8x128xi32, #tpu.memory_space<vmem>>, vector<1x1x8x128xi32>
    %6 = vector.shape_cast %5 : vector<1x1x8x128xi32> to vector<8x128xi32>
    %c0_10 = arith.constant 0 : index
    %c2 = arith.constant 2 : index
    %c0_11 = arith.constant 0 : index
    %c0_12 = arith.constant 0 : index
    %7 = vector.load %arg1[%c0_10, %c2, %c0_11, %c0_12] : memref<1x4x8x128xi32, #tpu.memory_space<vmem>>, vector<1x1x8x128xi32>
    %8 = vector.shape_cast %7 : vector<1x1x8x128xi32> to vector<8x128xi32>
    %c0_13 = arith.constant 0 : index
    %c3 = arith.constant 3 : index
    %c0_14 = arith.constant 0 : index
    %c0_15 = arith.constant 0 : index
    %9 = vector.load %arg1[%c0_13, %c3, %c0_14, %c0_15] : memref<1x4x8x128xi32, #tpu.memory_space<vmem>>, vector<1x1x8x128xi32>
    %10 = vector.shape_cast %9 : vector<1x1x8x128xi32> to vector<8x128xi32>
    %11 = vector.shape_cast %2 : vector<1x128xf32> to vector<1x128xf32>
    %12 = vector.broadcast %11 : vector<1x128xf32> to vector<8x128xf32>
    %c0_i32 = arith.constant 0 : i32
    %13 = vector.broadcast %c0_i32 : i32 to vector<8x128xi32>
    %14 = arith.subi %4, %13 : vector<8x128xi32>
    %c0_i32_16 = arith.constant 0 : i32
    %c127_i32 = arith.constant 127 : i32
    %15 = vector.broadcast %c0_i32_16 : i32 to vector<8x128xi32>
    %16 = arith.maxsi %15, %14 : vector<8x128xi32>
    %17 = vector.broadcast %c127_i32 : i32 to vector<8x128xi32>
    %18 = arith.minsi %17, %16 : vector<8x128xi32>
    %19 = vector.shape_cast %18 : vector<8x128xi32> to vector<8x128x1xi32>
    %20 = vector.shape_cast %19 : vector<8x128x1xi32> to vector<8x128xi32>
    %21 = tpu.dynamic_gather %12[%20] in [1] : vector<8x128xf32>, vector<8x128xi32> -> vector<8x128xf32>
    %22 = arith.addf %1, %21 : vector<8x128xf32>
    %c0_i32_17 = arith.constant 0 : i32
    %23 = vector.broadcast %c0_i32_17 : i32 to vector<8x128xi32>
    %24 = arith.subi %6, %23 : vector<8x128xi32>
    %c0_i32_18 = arith.constant 0 : i32
    %c127_i32_19 = arith.constant 127 : i32
    %25 = vector.broadcast %c0_i32_18 : i32 to vector<8x128xi32>
    %26 = arith.maxsi %25, %24 : vector<8x128xi32>
    %27 = vector.broadcast %c127_i32_19 : i32 to vector<8x128xi32>
    %28 = arith.minsi %27, %26 : vector<8x128xi32>
    %29 = vector.shape_cast %28 : vector<8x128xi32> to vector<8x128x1xi32>
    %30 = vector.shape_cast %29 : vector<8x128x1xi32> to vector<8x128xi32>
    %31 = tpu.dynamic_gather %12[%30] in [1] : vector<8x128xf32>, vector<8x128xi32> -> vector<8x128xf32>
    %32 = arith.addf %22, %31 : vector<8x128xf32>
    %c0_i32_20 = arith.constant 0 : i32
    %33 = vector.broadcast %c0_i32_20 : i32 to vector<8x128xi32>
    %34 = arith.subi %8, %33 : vector<8x128xi32>
    %c0_i32_21 = arith.constant 0 : i32
    %c127_i32_22 = arith.constant 127 : i32
    %35 = vector.broadcast %c0_i32_21 : i32 to vector<8x128xi32>
    %36 = arith.maxsi %35, %34 : vector<8x128xi32>
    %37 = vector.broadcast %c127_i32_22 : i32 to vector<8x128xi32>
    %38 = arith.minsi %37, %36 : vector<8x128xi32>
    %39 = vector.shape_cast %38 : vector<8x128xi32> to vector<8x128x1xi32>
    %40 = vector.shape_cast %39 : vector<8x128x1xi32> to vector<8x128xi32>
    %41 = tpu.dynamic_gather %12[%40] in [1] : vector<8x128xf32>, vector<8x128xi32> -> vector<8x128xf32>
    %42 = arith.addf %32, %41 : vector<8x128xf32>
    %c0_i32_23 = arith.constant 0 : i32
    %43 = vector.broadcast %c0_i32_23 : i32 to vector<8x128xi32>
    %44 = arith.subi %10, %43 : vector<8x128xi32>
    %c0_i32_24 = arith.constant 0 : i32
    %c127_i32_25 = arith.constant 127 : i32
    %45 = vector.broadcast %c0_i32_24 : i32 to vector<8x128xi32>
    %46 = arith.maxsi %45, %44 : vector<8x128xi32>
    %47 = vector.broadcast %c127_i32_25 : i32 to vector<8x128xi32>
    %48 = arith.minsi %47, %46 : vector<8x128xi32>
    %49 = vector.shape_cast %48 : vector<8x128xi32> to vector<8x128x1xi32>
    %50 = vector.shape_cast %49 : vector<8x128x1xi32> to vector<8x128xi32>
    %51 = tpu.dynamic_gather %12[%50] in [1] : vector<8x128xf32>, vector<8x128xi32> -> vector<8x128xf32>
    %52 = arith.addf %42, %51 : vector<8x128xf32>
    %c0_26 = arith.constant 0 : index
    %c0_27 = arith.constant 0 : index
    %c0_28 = arith.constant 0 : index
    %53 = vector.load %arg4[%c0_26, %c0_27, %c0_28] : memref<1x8x128xf32, #tpu.memory_space<vmem>>, vector<1x8x128xf32>
    %54 = vector.shape_cast %53 : vector<1x8x128xf32> to vector<8x128xf32>
    %55 = vector.shape_cast %52 : vector<8x128xf32> to vector<1x8x128xf32>
    tpu.vector_store %arg4[%c0_26, %c0_27, %c0_28], %55 {strides = array<i32>} : memref<1x8x128xf32, #tpu.memory_space<vmem>>, vector<1x8x128xf32>,
    return
  }
  func.func @transform_0(%arg0: i32) -> (i32, i32, i32, i32) {
    %c0_i32 = arith.constant 0 : i32
    %c0_i32_0 = arith.constant 0 : i32
    %c0_i32_1 = arith.constant 0 : i32
    %c0_i32_2 = arith.constant 0 : i32
    return %arg0, %c0_i32, %c0_i32_0, %c0_i32_1 : i32, i32, i32, i32
  }
  func.func @transform_1(%arg0: i32) -> (i32, i32) {
    %c0_i32 = arith.constant 0 : i32
    %c0_i32_0 = arith.constant 0 : i32
    %c0_i32_1 = arith.constant 0 : i32
    return %c0_i32, %c0_i32_0 : i32, i32
  }
  func.func @transform_2(%arg0: i32) -> (i32, i32) {
    %c0_i32 = arith.constant 0 : i32
    %c0_i32_0 = arith.constant 0 : i32
    %c0_i32_1 = arith.constant 0 : i32
    return %c0_i32, %c0_i32_0 : i32, i32
  }
  func.func @transform_3(%arg0: i32) -> (i32, i32, i32) {
    %c0_i32 = arith.constant 0 : i32
    %c0_i32_0 = arith.constant 0 : i32
    %c0_i32_1 = arith.constant 0 : i32
    return %arg0, %c0_i32, %c0_i32_0 : i32, i32, i32
  }
}

module attributes {stable_mosaic.version = 11 : i64} {
  func.func @_fm_linear_select_kernel(%arg0: i32, %arg1: memref<1x4x8x128xi32, #tpu.memory_space<vmem>>, %arg2: memref<32xf32, #tpu.memory_space<smem>>, %arg3: memref<1x1xf32, #tpu.memory_space<smem>>, %arg4: memref<1x8x128xf32, #tpu.memory_space<vmem>>) attributes {dimension_semantics = [#tpu.dimension_semantics<parallel>], iteration_bounds = array<i64: 1>, scalar_prefetch = 0 : i64, scratch_operands = 0 : i64, tpu.core_type = #tpu.core_type<tc>, window_params = [{transform_indices = @transform_0, window_bounds = array<i64: 1, 4, 8, 128>}, {transform_indices = @transform_1, window_bounds = array<i64: 32>}, {transform_indices = @transform_2, window_bounds = array<i64: 1, 1>}, {transform_indices = @transform_3, window_bounds = array<i64: 1, 8, 128>}]} {
    %c0 = arith.constant 0 : index
    %c0_0 = arith.constant 0 : index
    %0 = memref.load %arg3[%c0, %c0_0] : memref<1x1xf32, #tpu.memory_space<smem>>
    %1 = vector.broadcast %0 : f32 to vector<8x128xf32>
    %c0_1 = arith.constant 0 : index
    %c0_2 = arith.constant 0 : index
    %c0_3 = arith.constant 0 : index
    %c0_4 = arith.constant 0 : index
    %2 = vector.load %arg1[%c0_1, %c0_2, %c0_3, %c0_4] : memref<1x4x8x128xi32, #tpu.memory_space<vmem>>, vector<1x1x8x128xi32>
    %3 = vector.shape_cast %2 : vector<1x1x8x128xi32> to vector<8x128xi32>
    %cst = arith.constant 0.000000e+00 : f32
    %4 = vector.broadcast %cst : f32 to vector<8x128xf32>
    %c0_i32 = arith.constant 0 : i32
    %5 = vector.broadcast %c0_i32 : i32 to vector<8x128xi32>
    %6 = arith.cmpi eq, %3, %5 : vector<8x128xi32>
    %c0_5 = arith.constant 0 : index
    %7 = memref.load %arg2[%c0_5] : memref<32xf32, #tpu.memory_space<smem>>
    %8 = vector.broadcast %7 : f32 to vector<8x128xf32>
    %9 = arith.select %6, %8, %4 : vector<8x128xi1>, vector<8x128xf32>
    %c1_i32 = arith.constant 1 : i32
    %10 = vector.broadcast %c1_i32 : i32 to vector<8x128xi32>
    %11 = arith.cmpi eq, %3, %10 : vector<8x128xi32>
    %c1 = arith.constant 1 : index
    %12 = memref.load %arg2[%c1] : memref<32xf32, #tpu.memory_space<smem>>
    %13 = vector.broadcast %12 : f32 to vector<8x128xf32>
    %14 = arith.select %11, %13, %9 : vector<8x128xi1>, vector<8x128xf32>
    %c2_i32 = arith.constant 2 : i32
    %15 = vector.broadcast %c2_i32 : i32 to vector<8x128xi32>
    %16 = arith.cmpi eq, %3, %15 : vector<8x128xi32>
    %c2 = arith.constant 2 : index
    %17 = memref.load %arg2[%c2] : memref<32xf32, #tpu.memory_space<smem>>
    %18 = vector.broadcast %17 : f32 to vector<8x128xf32>
    %19 = arith.select %16, %18, %14 : vector<8x128xi1>, vector<8x128xf32>
    %c3_i32 = arith.constant 3 : i32
    %20 = vector.broadcast %c3_i32 : i32 to vector<8x128xi32>
    %21 = arith.cmpi eq, %3, %20 : vector<8x128xi32>
    %c3 = arith.constant 3 : index
    %22 = memref.load %arg2[%c3] : memref<32xf32, #tpu.memory_space<smem>>
    %23 = vector.broadcast %22 : f32 to vector<8x128xf32>
    %24 = arith.select %21, %23, %19 : vector<8x128xi1>, vector<8x128xf32>
    %c4_i32 = arith.constant 4 : i32
    %25 = vector.broadcast %c4_i32 : i32 to vector<8x128xi32>
    %26 = arith.cmpi eq, %3, %25 : vector<8x128xi32>
    %c4 = arith.constant 4 : index
    %27 = memref.load %arg2[%c4] : memref<32xf32, #tpu.memory_space<smem>>
    %28 = vector.broadcast %27 : f32 to vector<8x128xf32>
    %29 = arith.select %26, %28, %24 : vector<8x128xi1>, vector<8x128xf32>
    %c5_i32 = arith.constant 5 : i32
    %30 = vector.broadcast %c5_i32 : i32 to vector<8x128xi32>
    %31 = arith.cmpi eq, %3, %30 : vector<8x128xi32>
    %c5 = arith.constant 5 : index
    %32 = memref.load %arg2[%c5] : memref<32xf32, #tpu.memory_space<smem>>
    %33 = vector.broadcast %32 : f32 to vector<8x128xf32>
    %34 = arith.select %31, %33, %29 : vector<8x128xi1>, vector<8x128xf32>
    %c6_i32 = arith.constant 6 : i32
    %35 = vector.broadcast %c6_i32 : i32 to vector<8x128xi32>
    %36 = arith.cmpi eq, %3, %35 : vector<8x128xi32>
    %c6 = arith.constant 6 : index
    %37 = memref.load %arg2[%c6] : memref<32xf32, #tpu.memory_space<smem>>
    %38 = vector.broadcast %37 : f32 to vector<8x128xf32>
    %39 = arith.select %36, %38, %34 : vector<8x128xi1>, vector<8x128xf32>
    %c7_i32 = arith.constant 7 : i32
    %40 = vector.broadcast %c7_i32 : i32 to vector<8x128xi32>
    %41 = arith.cmpi eq, %3, %40 : vector<8x128xi32>
    %c7 = arith.constant 7 : index
    %42 = memref.load %arg2[%c7] : memref<32xf32, #tpu.memory_space<smem>>
    %43 = vector.broadcast %42 : f32 to vector<8x128xf32>
    %44 = arith.select %41, %43, %39 : vector<8x128xi1>, vector<8x128xf32>
    %c8_i32 = arith.constant 8 : i32
    %45 = vector.broadcast %c8_i32 : i32 to vector<8x128xi32>
    %46 = arith.cmpi eq, %3, %45 : vector<8x128xi32>
    %c8 = arith.constant 8 : index
    %47 = memref.load %arg2[%c8] : memref<32xf32, #tpu.memory_space<smem>>
    %48 = vector.broadcast %47 : f32 to vector<8x128xf32>
    %49 = arith.select %46, %48, %44 : vector<8x128xi1>, vector<8x128xf32>
    %c9_i32 = arith.constant 9 : i32
    %50 = vector.broadcast %c9_i32 : i32 to vector<8x128xi32>
    %51 = arith.cmpi eq, %3, %50 : vector<8x128xi32>
    %c9 = arith.constant 9 : index
    %52 = memref.load %arg2[%c9] : memref<32xf32, #tpu.memory_space<smem>>
    %53 = vector.broadcast %52 : f32 to vector<8x128xf32>
    %54 = arith.select %51, %53, %49 : vector<8x128xi1>, vector<8x128xf32>
    %c10_i32 = arith.constant 10 : i32
    %55 = vector.broadcast %c10_i32 : i32 to vector<8x128xi32>
    %56 = arith.cmpi eq, %3, %55 : vector<8x128xi32>
    %c10 = arith.constant 10 : index
    %57 = memref.load %arg2[%c10] : memref<32xf32, #tpu.memory_space<smem>>
    %58 = vector.broadcast %57 : f32 to vector<8x128xf32>
    %59 = arith.select %56, %58, %54 : vector<8x128xi1>, vector<8x128xf32>
    %c11_i32 = arith.constant 11 : i32
    %60 = vector.broadcast %c11_i32 : i32 to vector<8x128xi32>
    %61 = arith.cmpi eq, %3, %60 : vector<8x128xi32>
    %c11 = arith.constant 11 : index
    %62 = memref.load %arg2[%c11] : memref<32xf32, #tpu.memory_space<smem>>
    %63 = vector.broadcast %62 : f32 to vector<8x128xf32>
    %64 = arith.select %61, %63, %59 : vector<8x128xi1>, vector<8x128xf32>
    %c12_i32 = arith.constant 12 : i32
    %65 = vector.broadcast %c12_i32 : i32 to vector<8x128xi32>
    %66 = arith.cmpi eq, %3, %65 : vector<8x128xi32>
    %c12 = arith.constant 12 : index
    %67 = memref.load %arg2[%c12] : memref<32xf32, #tpu.memory_space<smem>>
    %68 = vector.broadcast %67 : f32 to vector<8x128xf32>
    %69 = arith.select %66, %68, %64 : vector<8x128xi1>, vector<8x128xf32>
    %c13_i32 = arith.constant 13 : i32
    %70 = vector.broadcast %c13_i32 : i32 to vector<8x128xi32>
    %71 = arith.cmpi eq, %3, %70 : vector<8x128xi32>
    %c13 = arith.constant 13 : index
    %72 = memref.load %arg2[%c13] : memref<32xf32, #tpu.memory_space<smem>>
    %73 = vector.broadcast %72 : f32 to vector<8x128xf32>
    %74 = arith.select %71, %73, %69 : vector<8x128xi1>, vector<8x128xf32>
    %c14_i32 = arith.constant 14 : i32
    %75 = vector.broadcast %c14_i32 : i32 to vector<8x128xi32>
    %76 = arith.cmpi eq, %3, %75 : vector<8x128xi32>
    %c14 = arith.constant 14 : index
    %77 = memref.load %arg2[%c14] : memref<32xf32, #tpu.memory_space<smem>>
    %78 = vector.broadcast %77 : f32 to vector<8x128xf32>
    %79 = arith.select %76, %78, %74 : vector<8x128xi1>, vector<8x128xf32>
    %c15_i32 = arith.constant 15 : i32
    %80 = vector.broadcast %c15_i32 : i32 to vector<8x128xi32>
    %81 = arith.cmpi eq, %3, %80 : vector<8x128xi32>
    %c15 = arith.constant 15 : index
    %82 = memref.load %arg2[%c15] : memref<32xf32, #tpu.memory_space<smem>>
    %83 = vector.broadcast %82 : f32 to vector<8x128xf32>
    %84 = arith.select %81, %83, %79 : vector<8x128xi1>, vector<8x128xf32>
    %c16_i32 = arith.constant 16 : i32
    %85 = vector.broadcast %c16_i32 : i32 to vector<8x128xi32>
    %86 = arith.cmpi eq, %3, %85 : vector<8x128xi32>
    %c16 = arith.constant 16 : index
    %87 = memref.load %arg2[%c16] : memref<32xf32, #tpu.memory_space<smem>>
    %88 = vector.broadcast %87 : f32 to vector<8x128xf32>
    %89 = arith.select %86, %88, %84 : vector<8x128xi1>, vector<8x128xf32>
    %c17_i32 = arith.constant 17 : i32
    %90 = vector.broadcast %c17_i32 : i32 to vector<8x128xi32>
    %91 = arith.cmpi eq, %3, %90 : vector<8x128xi32>
    %c17 = arith.constant 17 : index
    %92 = memref.load %arg2[%c17] : memref<32xf32, #tpu.memory_space<smem>>
    %93 = vector.broadcast %92 : f32 to vector<8x128xf32>
    %94 = arith.select %91, %93, %89 : vector<8x128xi1>, vector<8x128xf32>
    %c18_i32 = arith.constant 18 : i32
    %95 = vector.broadcast %c18_i32 : i32 to vector<8x128xi32>
    %96 = arith.cmpi eq, %3, %95 : vector<8x128xi32>
    %c18 = arith.constant 18 : index
    %97 = memref.load %arg2[%c18] : memref<32xf32, #tpu.memory_space<smem>>
    %98 = vector.broadcast %97 : f32 to vector<8x128xf32>
    %99 = arith.select %96, %98, %94 : vector<8x128xi1>, vector<8x128xf32>
    %c19_i32 = arith.constant 19 : i32
    %100 = vector.broadcast %c19_i32 : i32 to vector<8x128xi32>
    %101 = arith.cmpi eq, %3, %100 : vector<8x128xi32>
    %c19 = arith.constant 19 : index
    %102 = memref.load %arg2[%c19] : memref<32xf32, #tpu.memory_space<smem>>
    %103 = vector.broadcast %102 : f32 to vector<8x128xf32>
    %104 = arith.select %101, %103, %99 : vector<8x128xi1>, vector<8x128xf32>
    %c20_i32 = arith.constant 20 : i32
    %105 = vector.broadcast %c20_i32 : i32 to vector<8x128xi32>
    %106 = arith.cmpi eq, %3, %105 : vector<8x128xi32>
    %c20 = arith.constant 20 : index
    %107 = memref.load %arg2[%c20] : memref<32xf32, #tpu.memory_space<smem>>
    %108 = vector.broadcast %107 : f32 to vector<8x128xf32>
    %109 = arith.select %106, %108, %104 : vector<8x128xi1>, vector<8x128xf32>
    %c21_i32 = arith.constant 21 : i32
    %110 = vector.broadcast %c21_i32 : i32 to vector<8x128xi32>
    %111 = arith.cmpi eq, %3, %110 : vector<8x128xi32>
    %c21 = arith.constant 21 : index
    %112 = memref.load %arg2[%c21] : memref<32xf32, #tpu.memory_space<smem>>
    %113 = vector.broadcast %112 : f32 to vector<8x128xf32>
    %114 = arith.select %111, %113, %109 : vector<8x128xi1>, vector<8x128xf32>
    %c22_i32 = arith.constant 22 : i32
    %115 = vector.broadcast %c22_i32 : i32 to vector<8x128xi32>
    %116 = arith.cmpi eq, %3, %115 : vector<8x128xi32>
    %c22 = arith.constant 22 : index
    %117 = memref.load %arg2[%c22] : memref<32xf32, #tpu.memory_space<smem>>
    %118 = vector.broadcast %117 : f32 to vector<8x128xf32>
    %119 = arith.select %116, %118, %114 : vector<8x128xi1>, vector<8x128xf32>
    %c23_i32 = arith.constant 23 : i32
    %120 = vector.broadcast %c23_i32 : i32 to vector<8x128xi32>
    %121 = arith.cmpi eq, %3, %120 : vector<8x128xi32>
    %c23 = arith.constant 23 : index
    %122 = memref.load %arg2[%c23] : memref<32xf32, #tpu.memory_space<smem>>
    %123 = vector.broadcast %122 : f32 to vector<8x128xf32>
    %124 = arith.select %121, %123, %119 : vector<8x128xi1>, vector<8x128xf32>
    %c24_i32 = arith.constant 24 : i32
    %125 = vector.broadcast %c24_i32 : i32 to vector<8x128xi32>
    %126 = arith.cmpi eq, %3, %125 : vector<8x128xi32>
    %c24 = arith.constant 24 : index
    %127 = memref.load %arg2[%c24] : memref<32xf32, #tpu.memory_space<smem>>
    %128 = vector.broadcast %127 : f32 to vector<8x128xf32>
    %129 = arith.select %126, %128, %124 : vector<8x128xi1>, vector<8x128xf32>
    %c25_i32 = arith.constant 25 : i32
    %130 = vector.broadcast %c25_i32 : i32 to vector<8x128xi32>
    %131 = arith.cmpi eq, %3, %130 : vector<8x128xi32>
    %c25 = arith.constant 25 : index
    %132 = memref.load %arg2[%c25] : memref<32xf32, #tpu.memory_space<smem>>
    %133 = vector.broadcast %132 : f32 to vector<8x128xf32>
    %134 = arith.select %131, %133, %129 : vector<8x128xi1>, vector<8x128xf32>
    %c26_i32 = arith.constant 26 : i32
    %135 = vector.broadcast %c26_i32 : i32 to vector<8x128xi32>
    %136 = arith.cmpi eq, %3, %135 : vector<8x128xi32>
    %c26 = arith.constant 26 : index
    %137 = memref.load %arg2[%c26] : memref<32xf32, #tpu.memory_space<smem>>
    %138 = vector.broadcast %137 : f32 to vector<8x128xf32>
    %139 = arith.select %136, %138, %134 : vector<8x128xi1>, vector<8x128xf32>
    %c27_i32 = arith.constant 27 : i32
    %140 = vector.broadcast %c27_i32 : i32 to vector<8x128xi32>
    %141 = arith.cmpi eq, %3, %140 : vector<8x128xi32>
    %c27 = arith.constant 27 : index
    %142 = memref.load %arg2[%c27] : memref<32xf32, #tpu.memory_space<smem>>
    %143 = vector.broadcast %142 : f32 to vector<8x128xf32>
    %144 = arith.select %141, %143, %139 : vector<8x128xi1>, vector<8x128xf32>
    %c28_i32 = arith.constant 28 : i32
    %145 = vector.broadcast %c28_i32 : i32 to vector<8x128xi32>
    %146 = arith.cmpi eq, %3, %145 : vector<8x128xi32>
    %c28 = arith.constant 28 : index
    %147 = memref.load %arg2[%c28] : memref<32xf32, #tpu.memory_space<smem>>
    %148 = vector.broadcast %147 : f32 to vector<8x128xf32>
    %149 = arith.select %146, %148, %144 : vector<8x128xi1>, vector<8x128xf32>
    %c29_i32 = arith.constant 29 : i32
    %150 = vector.broadcast %c29_i32 : i32 to vector<8x128xi32>
    %151 = arith.cmpi eq, %3, %150 : vector<8x128xi32>
    %c29 = arith.constant 29 : index
    %152 = memref.load %arg2[%c29] : memref<32xf32, #tpu.memory_space<smem>>
    %153 = vector.broadcast %152 : f32 to vector<8x128xf32>
    %154 = arith.select %151, %153, %149 : vector<8x128xi1>, vector<8x128xf32>
    %c30_i32 = arith.constant 30 : i32
    %155 = vector.broadcast %c30_i32 : i32 to vector<8x128xi32>
    %156 = arith.cmpi eq, %3, %155 : vector<8x128xi32>
    %c30 = arith.constant 30 : index
    %157 = memref.load %arg2[%c30] : memref<32xf32, #tpu.memory_space<smem>>
    %158 = vector.broadcast %157 : f32 to vector<8x128xf32>
    %159 = arith.select %156, %158, %154 : vector<8x128xi1>, vector<8x128xf32>
    %c31_i32 = arith.constant 31 : i32
    %160 = vector.broadcast %c31_i32 : i32 to vector<8x128xi32>
    %161 = arith.cmpi eq, %3, %160 : vector<8x128xi32>
    %c31 = arith.constant 31 : index
    %162 = memref.load %arg2[%c31] : memref<32xf32, #tpu.memory_space<smem>>
    %163 = vector.broadcast %162 : f32 to vector<8x128xf32>
    %164 = arith.select %161, %163, %159 : vector<8x128xi1>, vector<8x128xf32>
    %165 = arith.addf %1, %164 : vector<8x128xf32>
    %c0_6 = arith.constant 0 : index
    %c1_7 = arith.constant 1 : index
    %c0_8 = arith.constant 0 : index
    %c0_9 = arith.constant 0 : index
    %166 = vector.load %arg1[%c0_6, %c1_7, %c0_8, %c0_9] : memref<1x4x8x128xi32, #tpu.memory_space<vmem>>, vector<1x1x8x128xi32>
    %167 = vector.shape_cast %166 : vector<1x1x8x128xi32> to vector<8x128xi32>
    %cst_10 = arith.constant 0.000000e+00 : f32
    %168 = vector.broadcast %cst_10 : f32 to vector<8x128xf32>
    %c0_i32_11 = arith.constant 0 : i32
    %169 = vector.broadcast %c0_i32_11 : i32 to vector<8x128xi32>
    %170 = arith.cmpi eq, %167, %169 : vector<8x128xi32>
    %c0_12 = arith.constant 0 : index
    %171 = memref.load %arg2[%c0_12] : memref<32xf32, #tpu.memory_space<smem>>
    %172 = vector.broadcast %171 : f32 to vector<8x128xf32>
    %173 = arith.select %170, %172, %168 : vector<8x128xi1>, vector<8x128xf32>
    %c1_i32_13 = arith.constant 1 : i32
    %174 = vector.broadcast %c1_i32_13 : i32 to vector<8x128xi32>
    %175 = arith.cmpi eq, %167, %174 : vector<8x128xi32>
    %c1_14 = arith.constant 1 : index
    %176 = memref.load %arg2[%c1_14] : memref<32xf32, #tpu.memory_space<smem>>
    %177 = vector.broadcast %176 : f32 to vector<8x128xf32>
    %178 = arith.select %175, %177, %173 : vector<8x128xi1>, vector<8x128xf32>
    %c2_i32_15 = arith.constant 2 : i32
    %179 = vector.broadcast %c2_i32_15 : i32 to vector<8x128xi32>
    %180 = arith.cmpi eq, %167, %179 : vector<8x128xi32>
    %c2_16 = arith.constant 2 : index
    %181 = memref.load %arg2[%c2_16] : memref<32xf32, #tpu.memory_space<smem>>
    %182 = vector.broadcast %181 : f32 to vector<8x128xf32>
    %183 = arith.select %180, %182, %178 : vector<8x128xi1>, vector<8x128xf32>
    %c3_i32_17 = arith.constant 3 : i32
    %184 = vector.broadcast %c3_i32_17 : i32 to vector<8x128xi32>
    %185 = arith.cmpi eq, %167, %184 : vector<8x128xi32>
    %c3_18 = arith.constant 3 : index
    %186 = memref.load %arg2[%c3_18] : memref<32xf32, #tpu.memory_space<smem>>
    %187 = vector.broadcast %186 : f32 to vector<8x128xf32>
    %188 = arith.select %185, %187, %183 : vector<8x128xi1>, vector<8x128xf32>
    %c4_i32_19 = arith.constant 4 : i32
    %189 = vector.broadcast %c4_i32_19 : i32 to vector<8x128xi32>
    %190 = arith.cmpi eq, %167, %189 : vector<8x128xi32>
    %c4_20 = arith.constant 4 : index
    %191 = memref.load %arg2[%c4_20] : memref<32xf32, #tpu.memory_space<smem>>
    %192 = vector.broadcast %191 : f32 to vector<8x128xf32>
    %193 = arith.select %190, %192, %188 : vector<8x128xi1>, vector<8x128xf32>
    %c5_i32_21 = arith.constant 5 : i32
    %194 = vector.broadcast %c5_i32_21 : i32 to vector<8x128xi32>
    %195 = arith.cmpi eq, %167, %194 : vector<8x128xi32>
    %c5_22 = arith.constant 5 : index
    %196 = memref.load %arg2[%c5_22] : memref<32xf32, #tpu.memory_space<smem>>
    %197 = vector.broadcast %196 : f32 to vector<8x128xf32>
    %198 = arith.select %195, %197, %193 : vector<8x128xi1>, vector<8x128xf32>
    %c6_i32_23 = arith.constant 6 : i32
    %199 = vector.broadcast %c6_i32_23 : i32 to vector<8x128xi32>
    %200 = arith.cmpi eq, %167, %199 : vector<8x128xi32>
    %c6_24 = arith.constant 6 : index
    %201 = memref.load %arg2[%c6_24] : memref<32xf32, #tpu.memory_space<smem>>
    %202 = vector.broadcast %201 : f32 to vector<8x128xf32>
    %203 = arith.select %200, %202, %198 : vector<8x128xi1>, vector<8x128xf32>
    %c7_i32_25 = arith.constant 7 : i32
    %204 = vector.broadcast %c7_i32_25 : i32 to vector<8x128xi32>
    %205 = arith.cmpi eq, %167, %204 : vector<8x128xi32>
    %c7_26 = arith.constant 7 : index
    %206 = memref.load %arg2[%c7_26] : memref<32xf32, #tpu.memory_space<smem>>
    %207 = vector.broadcast %206 : f32 to vector<8x128xf32>
    %208 = arith.select %205, %207, %203 : vector<8x128xi1>, vector<8x128xf32>
    %c8_i32_27 = arith.constant 8 : i32
    %209 = vector.broadcast %c8_i32_27 : i32 to vector<8x128xi32>
    %210 = arith.cmpi eq, %167, %209 : vector<8x128xi32>
    %c8_28 = arith.constant 8 : index
    %211 = memref.load %arg2[%c8_28] : memref<32xf32, #tpu.memory_space<smem>>
    %212 = vector.broadcast %211 : f32 to vector<8x128xf32>
    %213 = arith.select %210, %212, %208 : vector<8x128xi1>, vector<8x128xf32>
    %c9_i32_29 = arith.constant 9 : i32
    %214 = vector.broadcast %c9_i32_29 : i32 to vector<8x128xi32>
    %215 = arith.cmpi eq, %167, %214 : vector<8x128xi32>
    %c9_30 = arith.constant 9 : index
    %216 = memref.load %arg2[%c9_30] : memref<32xf32, #tpu.memory_space<smem>>
    %217 = vector.broadcast %216 : f32 to vector<8x128xf32>
    %218 = arith.select %215, %217, %213 : vector<8x128xi1>, vector<8x128xf32>
    %c10_i32_31 = arith.constant 10 : i32
    %219 = vector.broadcast %c10_i32_31 : i32 to vector<8x128xi32>
    %220 = arith.cmpi eq, %167, %219 : vector<8x128xi32>
    %c10_32 = arith.constant 10 : index
    %221 = memref.load %arg2[%c10_32] : memref<32xf32, #tpu.memory_space<smem>>
    %222 = vector.broadcast %221 : f32 to vector<8x128xf32>
    %223 = arith.select %220, %222, %218 : vector<8x128xi1>, vector<8x128xf32>
    %c11_i32_33 = arith.constant 11 : i32
    %224 = vector.broadcast %c11_i32_33 : i32 to vector<8x128xi32>
    %225 = arith.cmpi eq, %167, %224 : vector<8x128xi32>
    %c11_34 = arith.constant 11 : index
    %226 = memref.load %arg2[%c11_34] : memref<32xf32, #tpu.memory_space<smem>>
    %227 = vector.broadcast %226 : f32 to vector<8x128xf32>
    %228 = arith.select %225, %227, %223 : vector<8x128xi1>, vector<8x128xf32>
    %c12_i32_35 = arith.constant 12 : i32
    %229 = vector.broadcast %c12_i32_35 : i32 to vector<8x128xi32>
    %230 = arith.cmpi eq, %167, %229 : vector<8x128xi32>
    %c12_36 = arith.constant 12 : index
    %231 = memref.load %arg2[%c12_36] : memref<32xf32, #tpu.memory_space<smem>>
    %232 = vector.broadcast %231 : f32 to vector<8x128xf32>
    %233 = arith.select %230, %232, %228 : vector<8x128xi1>, vector<8x128xf32>
    %c13_i32_37 = arith.constant 13 : i32
    %234 = vector.broadcast %c13_i32_37 : i32 to vector<8x128xi32>
    %235 = arith.cmpi eq, %167, %234 : vector<8x128xi32>
    %c13_38 = arith.constant 13 : index
    %236 = memref.load %arg2[%c13_38] : memref<32xf32, #tpu.memory_space<smem>>
    %237 = vector.broadcast %236 : f32 to vector<8x128xf32>
    %238 = arith.select %235, %237, %233 : vector<8x128xi1>, vector<8x128xf32>
    %c14_i32_39 = arith.constant 14 : i32
    %239 = vector.broadcast %c14_i32_39 : i32 to vector<8x128xi32>
    %240 = arith.cmpi eq, %167, %239 : vector<8x128xi32>
    %c14_40 = arith.constant 14 : index
    %241 = memref.load %arg2[%c14_40] : memref<32xf32, #tpu.memory_space<smem>>
    %242 = vector.broadcast %241 : f32 to vector<8x128xf32>
    %243 = arith.select %240, %242, %238 : vector<8x128xi1>, vector<8x128xf32>
    %c15_i32_41 = arith.constant 15 : i32
    %244 = vector.broadcast %c15_i32_41 : i32 to vector<8x128xi32>
    %245 = arith.cmpi eq, %167, %244 : vector<8x128xi32>
    %c15_42 = arith.constant 15 : index
    %246 = memref.load %arg2[%c15_42] : memref<32xf32, #tpu.memory_space<smem>>
    %247 = vector.broadcast %246 : f32 to vector<8x128xf32>
    %248 = arith.select %245, %247, %243 : vector<8x128xi1>, vector<8x128xf32>
    %c16_i32_43 = arith.constant 16 : i32
    %249 = vector.broadcast %c16_i32_43 : i32 to vector<8x128xi32>
    %250 = arith.cmpi eq, %167, %249 : vector<8x128xi32>
    %c16_44 = arith.constant 16 : index
    %251 = memref.load %arg2[%c16_44] : memref<32xf32, #tpu.memory_space<smem>>
    %252 = vector.broadcast %251 : f32 to vector<8x128xf32>
    %253 = arith.select %250, %252, %248 : vector<8x128xi1>, vector<8x128xf32>
    %c17_i32_45 = arith.constant 17 : i32
    %254 = vector.broadcast %c17_i32_45 : i32 to vector<8x128xi32>
    %255 = arith.cmpi eq, %167, %254 : vector<8x128xi32>
    %c17_46 = arith.constant 17 : index
    %256 = memref.load %arg2[%c17_46] : memref<32xf32, #tpu.memory_space<smem>>
    %257 = vector.broadcast %256 : f32 to vector<8x128xf32>
    %258 = arith.select %255, %257, %253 : vector<8x128xi1>, vector<8x128xf32>
    %c18_i32_47 = arith.constant 18 : i32
    %259 = vector.broadcast %c18_i32_47 : i32 to vector<8x128xi32>
    %260 = arith.cmpi eq, %167, %259 : vector<8x128xi32>
    %c18_48 = arith.constant 18 : index
    %261 = memref.load %arg2[%c18_48] : memref<32xf32, #tpu.memory_space<smem>>
    %262 = vector.broadcast %261 : f32 to vector<8x128xf32>
    %263 = arith.select %260, %262, %258 : vector<8x128xi1>, vector<8x128xf32>
    %c19_i32_49 = arith.constant 19 : i32
    %264 = vector.broadcast %c19_i32_49 : i32 to vector<8x128xi32>
    %265 = arith.cmpi eq, %167, %264 : vector<8x128xi32>
    %c19_50 = arith.constant 19 : index
    %266 = memref.load %arg2[%c19_50] : memref<32xf32, #tpu.memory_space<smem>>
    %267 = vector.broadcast %266 : f32 to vector<8x128xf32>
    %268 = arith.select %265, %267, %263 : vector<8x128xi1>, vector<8x128xf32>
    %c20_i32_51 = arith.constant 20 : i32
    %269 = vector.broadcast %c20_i32_51 : i32 to vector<8x128xi32>
    %270 = arith.cmpi eq, %167, %269 : vector<8x128xi32>
    %c20_52 = arith.constant 20 : index
    %271 = memref.load %arg2[%c20_52] : memref<32xf32, #tpu.memory_space<smem>>
    %272 = vector.broadcast %271 : f32 to vector<8x128xf32>
    %273 = arith.select %270, %272, %268 : vector<8x128xi1>, vector<8x128xf32>
    %c21_i32_53 = arith.constant 21 : i32
    %274 = vector.broadcast %c21_i32_53 : i32 to vector<8x128xi32>
    %275 = arith.cmpi eq, %167, %274 : vector<8x128xi32>
    %c21_54 = arith.constant 21 : index
    %276 = memref.load %arg2[%c21_54] : memref<32xf32, #tpu.memory_space<smem>>
    %277 = vector.broadcast %276 : f32 to vector<8x128xf32>
    %278 = arith.select %275, %277, %273 : vector<8x128xi1>, vector<8x128xf32>
    %c22_i32_55 = arith.constant 22 : i32
    %279 = vector.broadcast %c22_i32_55 : i32 to vector<8x128xi32>
    %280 = arith.cmpi eq, %167, %279 : vector<8x128xi32>
    %c22_56 = arith.constant 22 : index
    %281 = memref.load %arg2[%c22_56] : memref<32xf32, #tpu.memory_space<smem>>
    %282 = vector.broadcast %281 : f32 to vector<8x128xf32>
    %283 = arith.select %280, %282, %278 : vector<8x128xi1>, vector<8x128xf32>
    %c23_i32_57 = arith.constant 23 : i32
    %284 = vector.broadcast %c23_i32_57 : i32 to vector<8x128xi32>
    %285 = arith.cmpi eq, %167, %284 : vector<8x128xi32>
    %c23_58 = arith.constant 23 : index
    %286 = memref.load %arg2[%c23_58] : memref<32xf32, #tpu.memory_space<smem>>
    %287 = vector.broadcast %286 : f32 to vector<8x128xf32>
    %288 = arith.select %285, %287, %283 : vector<8x128xi1>, vector<8x128xf32>
    %c24_i32_59 = arith.constant 24 : i32
    %289 = vector.broadcast %c24_i32_59 : i32 to vector<8x128xi32>
    %290 = arith.cmpi eq, %167, %289 : vector<8x128xi32>
    %c24_60 = arith.constant 24 : index
    %291 = memref.load %arg2[%c24_60] : memref<32xf32, #tpu.memory_space<smem>>
    %292 = vector.broadcast %291 : f32 to vector<8x128xf32>
    %293 = arith.select %290, %292, %288 : vector<8x128xi1>, vector<8x128xf32>
    %c25_i32_61 = arith.constant 25 : i32
    %294 = vector.broadcast %c25_i32_61 : i32 to vector<8x128xi32>
    %295 = arith.cmpi eq, %167, %294 : vector<8x128xi32>
    %c25_62 = arith.constant 25 : index
    %296 = memref.load %arg2[%c25_62] : memref<32xf32, #tpu.memory_space<smem>>
    %297 = vector.broadcast %296 : f32 to vector<8x128xf32>
    %298 = arith.select %295, %297, %293 : vector<8x128xi1>, vector<8x128xf32>
    %c26_i32_63 = arith.constant 26 : i32
    %299 = vector.broadcast %c26_i32_63 : i32 to vector<8x128xi32>
    %300 = arith.cmpi eq, %167, %299 : vector<8x128xi32>
    %c26_64 = arith.constant 26 : index
    %301 = memref.load %arg2[%c26_64] : memref<32xf32, #tpu.memory_space<smem>>
    %302 = vector.broadcast %301 : f32 to vector<8x128xf32>
    %303 = arith.select %300, %302, %298 : vector<8x128xi1>, vector<8x128xf32>
    %c27_i32_65 = arith.constant 27 : i32
    %304 = vector.broadcast %c27_i32_65 : i32 to vector<8x128xi32>
    %305 = arith.cmpi eq, %167, %304 : vector<8x128xi32>
    %c27_66 = arith.constant 27 : index
    %306 = memref.load %arg2[%c27_66] : memref<32xf32, #tpu.memory_space<smem>>
    %307 = vector.broadcast %306 : f32 to vector<8x128xf32>
    %308 = arith.select %305, %307, %303 : vector<8x128xi1>, vector<8x128xf32>
    %c28_i32_67 = arith.constant 28 : i32
    %309 = vector.broadcast %c28_i32_67 : i32 to vector<8x128xi32>
    %310 = arith.cmpi eq, %167, %309 : vector<8x128xi32>
    %c28_68 = arith.constant 28 : index
    %311 = memref.load %arg2[%c28_68] : memref<32xf32, #tpu.memory_space<smem>>
    %312 = vector.broadcast %311 : f32 to vector<8x128xf32>
    %313 = arith.select %310, %312, %308 : vector<8x128xi1>, vector<8x128xf32>
    %c29_i32_69 = arith.constant 29 : i32
    %314 = vector.broadcast %c29_i32_69 : i32 to vector<8x128xi32>
    %315 = arith.cmpi eq, %167, %314 : vector<8x128xi32>
    %c29_70 = arith.constant 29 : index
    %316 = memref.load %arg2[%c29_70] : memref<32xf32, #tpu.memory_space<smem>>
    %317 = vector.broadcast %316 : f32 to vector<8x128xf32>
    %318 = arith.select %315, %317, %313 : vector<8x128xi1>, vector<8x128xf32>
    %c30_i32_71 = arith.constant 30 : i32
    %319 = vector.broadcast %c30_i32_71 : i32 to vector<8x128xi32>
    %320 = arith.cmpi eq, %167, %319 : vector<8x128xi32>
    %c30_72 = arith.constant 30 : index
    %321 = memref.load %arg2[%c30_72] : memref<32xf32, #tpu.memory_space<smem>>
    %322 = vector.broadcast %321 : f32 to vector<8x128xf32>
    %323 = arith.select %320, %322, %318 : vector<8x128xi1>, vector<8x128xf32>
    %c31_i32_73 = arith.constant 31 : i32
    %324 = vector.broadcast %c31_i32_73 : i32 to vector<8x128xi32>
    %325 = arith.cmpi eq, %167, %324 : vector<8x128xi32>
    %c31_74 = arith.constant 31 : index
    %326 = memref.load %arg2[%c31_74] : memref<32xf32, #tpu.memory_space<smem>>
    %327 = vector.broadcast %326 : f32 to vector<8x128xf32>
    %328 = arith.select %325, %327, %323 : vector<8x128xi1>, vector<8x128xf32>
    %329 = arith.addf %165, %328 : vector<8x128xf32>
    %c0_75 = arith.constant 0 : index
    %c2_76 = arith.constant 2 : index
    %c0_77 = arith.constant 0 : index
    %c0_78 = arith.constant 0 : index
    %330 = vector.load %arg1[%c0_75, %c2_76, %c0_77, %c0_78] : memref<1x4x8x128xi32, #tpu.memory_space<vmem>>, vector<1x1x8x128xi32>
    %331 = vector.shape_cast %330 : vector<1x1x8x128xi32> to vector<8x128xi32>
    %cst_79 = arith.constant 0.000000e+00 : f32
    %332 = vector.broadcast %cst_79 : f32 to vector<8x128xf32>
    %c0_i32_80 = arith.constant 0 : i32
    %333 = vector.broadcast %c0_i32_80 : i32 to vector<8x128xi32>
    %334 = arith.cmpi eq, %331, %333 : vector<8x128xi32>
    %c0_81 = arith.constant 0 : index
    %335 = memref.load %arg2[%c0_81] : memref<32xf32, #tpu.memory_space<smem>>
    %336 = vector.broadcast %335 : f32 to vector<8x128xf32>
    %337 = arith.select %334, %336, %332 : vector<8x128xi1>, vector<8x128xf32>
    %c1_i32_82 = arith.constant 1 : i32
    %338 = vector.broadcast %c1_i32_82 : i32 to vector<8x128xi32>
    %339 = arith.cmpi eq, %331, %338 : vector<8x128xi32>
    %c1_83 = arith.constant 1 : index
    %340 = memref.load %arg2[%c1_83] : memref<32xf32, #tpu.memory_space<smem>>
    %341 = vector.broadcast %340 : f32 to vector<8x128xf32>
    %342 = arith.select %339, %341, %337 : vector<8x128xi1>, vector<8x128xf32>
    %c2_i32_84 = arith.constant 2 : i32
    %343 = vector.broadcast %c2_i32_84 : i32 to vector<8x128xi32>
    %344 = arith.cmpi eq, %331, %343 : vector<8x128xi32>
    %c2_85 = arith.constant 2 : index
    %345 = memref.load %arg2[%c2_85] : memref<32xf32, #tpu.memory_space<smem>>
    %346 = vector.broadcast %345 : f32 to vector<8x128xf32>
    %347 = arith.select %344, %346, %342 : vector<8x128xi1>, vector<8x128xf32>
    %c3_i32_86 = arith.constant 3 : i32
    %348 = vector.broadcast %c3_i32_86 : i32 to vector<8x128xi32>
    %349 = arith.cmpi eq, %331, %348 : vector<8x128xi32>
    %c3_87 = arith.constant 3 : index
    %350 = memref.load %arg2[%c3_87] : memref<32xf32, #tpu.memory_space<smem>>
    %351 = vector.broadcast %350 : f32 to vector<8x128xf32>
    %352 = arith.select %349, %351, %347 : vector<8x128xi1>, vector<8x128xf32>
    %c4_i32_88 = arith.constant 4 : i32
    %353 = vector.broadcast %c4_i32_88 : i32 to vector<8x128xi32>
    %354 = arith.cmpi eq, %331, %353 : vector<8x128xi32>
    %c4_89 = arith.constant 4 : index
    %355 = memref.load %arg2[%c4_89] : memref<32xf32, #tpu.memory_space<smem>>
    %356 = vector.broadcast %355 : f32 to vector<8x128xf32>
    %357 = arith.select %354, %356, %352 : vector<8x128xi1>, vector<8x128xf32>
    %c5_i32_90 = arith.constant 5 : i32
    %358 = vector.broadcast %c5_i32_90 : i32 to vector<8x128xi32>
    %359 = arith.cmpi eq, %331, %358 : vector<8x128xi32>
    %c5_91 = arith.constant 5 : index
    %360 = memref.load %arg2[%c5_91] : memref<32xf32, #tpu.memory_space<smem>>
    %361 = vector.broadcast %360 : f32 to vector<8x128xf32>
    %362 = arith.select %359, %361, %357 : vector<8x128xi1>, vector<8x128xf32>
    %c6_i32_92 = arith.constant 6 : i32
    %363 = vector.broadcast %c6_i32_92 : i32 to vector<8x128xi32>
    %364 = arith.cmpi eq, %331, %363 : vector<8x128xi32>
    %c6_93 = arith.constant 6 : index
    %365 = memref.load %arg2[%c6_93] : memref<32xf32, #tpu.memory_space<smem>>
    %366 = vector.broadcast %365 : f32 to vector<8x128xf32>
    %367 = arith.select %364, %366, %362 : vector<8x128xi1>, vector<8x128xf32>
    %c7_i32_94 = arith.constant 7 : i32
    %368 = vector.broadcast %c7_i32_94 : i32 to vector<8x128xi32>
    %369 = arith.cmpi eq, %331, %368 : vector<8x128xi32>
    %c7_95 = arith.constant 7 : index
    %370 = memref.load %arg2[%c7_95] : memref<32xf32, #tpu.memory_space<smem>>
    %371 = vector.broadcast %370 : f32 to vector<8x128xf32>
    %372 = arith.select %369, %371, %367 : vector<8x128xi1>, vector<8x128xf32>
    %c8_i32_96 = arith.constant 8 : i32
    %373 = vector.broadcast %c8_i32_96 : i32 to vector<8x128xi32>
    %374 = arith.cmpi eq, %331, %373 : vector<8x128xi32>
    %c8_97 = arith.constant 8 : index
    %375 = memref.load %arg2[%c8_97] : memref<32xf32, #tpu.memory_space<smem>>
    %376 = vector.broadcast %375 : f32 to vector<8x128xf32>
    %377 = arith.select %374, %376, %372 : vector<8x128xi1>, vector<8x128xf32>
    %c9_i32_98 = arith.constant 9 : i32
    %378 = vector.broadcast %c9_i32_98 : i32 to vector<8x128xi32>
    %379 = arith.cmpi eq, %331, %378 : vector<8x128xi32>
    %c9_99 = arith.constant 9 : index
    %380 = memref.load %arg2[%c9_99] : memref<32xf32, #tpu.memory_space<smem>>
    %381 = vector.broadcast %380 : f32 to vector<8x128xf32>
    %382 = arith.select %379, %381, %377 : vector<8x128xi1>, vector<8x128xf32>
    %c10_i32_100 = arith.constant 10 : i32
    %383 = vector.broadcast %c10_i32_100 : i32 to vector<8x128xi32>
    %384 = arith.cmpi eq, %331, %383 : vector<8x128xi32>
    %c10_101 = arith.constant 10 : index
    %385 = memref.load %arg2[%c10_101] : memref<32xf32, #tpu.memory_space<smem>>
    %386 = vector.broadcast %385 : f32 to vector<8x128xf32>
    %387 = arith.select %384, %386, %382 : vector<8x128xi1>, vector<8x128xf32>
    %c11_i32_102 = arith.constant 11 : i32
    %388 = vector.broadcast %c11_i32_102 : i32 to vector<8x128xi32>
    %389 = arith.cmpi eq, %331, %388 : vector<8x128xi32>
    %c11_103 = arith.constant 11 : index
    %390 = memref.load %arg2[%c11_103] : memref<32xf32, #tpu.memory_space<smem>>
    %391 = vector.broadcast %390 : f32 to vector<8x128xf32>
    %392 = arith.select %389, %391, %387 : vector<8x128xi1>, vector<8x128xf32>
    %c12_i32_104 = arith.constant 12 : i32
    %393 = vector.broadcast %c12_i32_104 : i32 to vector<8x128xi32>
    %394 = arith.cmpi eq, %331, %393 : vector<8x128xi32>
    %c12_105 = arith.constant 12 : index
    %395 = memref.load %arg2[%c12_105] : memref<32xf32, #tpu.memory_space<smem>>
    %396 = vector.broadcast %395 : f32 to vector<8x128xf32>
    %397 = arith.select %394, %396, %392 : vector<8x128xi1>, vector<8x128xf32>
    %c13_i32_106 = arith.constant 13 : i32
    %398 = vector.broadcast %c13_i32_106 : i32 to vector<8x128xi32>
    %399 = arith.cmpi eq, %331, %398 : vector<8x128xi32>
    %c13_107 = arith.constant 13 : index
    %400 = memref.load %arg2[%c13_107] : memref<32xf32, #tpu.memory_space<smem>>
    %401 = vector.broadcast %400 : f32 to vector<8x128xf32>
    %402 = arith.select %399, %401, %397 : vector<8x128xi1>, vector<8x128xf32>
    %c14_i32_108 = arith.constant 14 : i32
    %403 = vector.broadcast %c14_i32_108 : i32 to vector<8x128xi32>
    %404 = arith.cmpi eq, %331, %403 : vector<8x128xi32>
    %c14_109 = arith.constant 14 : index
    %405 = memref.load %arg2[%c14_109] : memref<32xf32, #tpu.memory_space<smem>>
    %406 = vector.broadcast %405 : f32 to vector<8x128xf32>
    %407 = arith.select %404, %406, %402 : vector<8x128xi1>, vector<8x128xf32>
    %c15_i32_110 = arith.constant 15 : i32
    %408 = vector.broadcast %c15_i32_110 : i32 to vector<8x128xi32>
    %409 = arith.cmpi eq, %331, %408 : vector<8x128xi32>
    %c15_111 = arith.constant 15 : index
    %410 = memref.load %arg2[%c15_111] : memref<32xf32, #tpu.memory_space<smem>>
    %411 = vector.broadcast %410 : f32 to vector<8x128xf32>
    %412 = arith.select %409, %411, %407 : vector<8x128xi1>, vector<8x128xf32>
    %c16_i32_112 = arith.constant 16 : i32
    %413 = vector.broadcast %c16_i32_112 : i32 to vector<8x128xi32>
    %414 = arith.cmpi eq, %331, %413 : vector<8x128xi32>
    %c16_113 = arith.constant 16 : index
    %415 = memref.load %arg2[%c16_113] : memref<32xf32, #tpu.memory_space<smem>>
    %416 = vector.broadcast %415 : f32 to vector<8x128xf32>
    %417 = arith.select %414, %416, %412 : vector<8x128xi1>, vector<8x128xf32>
    %c17_i32_114 = arith.constant 17 : i32
    %418 = vector.broadcast %c17_i32_114 : i32 to vector<8x128xi32>
    %419 = arith.cmpi eq, %331, %418 : vector<8x128xi32>
    %c17_115 = arith.constant 17 : index
    %420 = memref.load %arg2[%c17_115] : memref<32xf32, #tpu.memory_space<smem>>
    %421 = vector.broadcast %420 : f32 to vector<8x128xf32>
    %422 = arith.select %419, %421, %417 : vector<8x128xi1>, vector<8x128xf32>
    %c18_i32_116 = arith.constant 18 : i32
    %423 = vector.broadcast %c18_i32_116 : i32 to vector<8x128xi32>
    %424 = arith.cmpi eq, %331, %423 : vector<8x128xi32>
    %c18_117 = arith.constant 18 : index
    %425 = memref.load %arg2[%c18_117] : memref<32xf32, #tpu.memory_space<smem>>
    %426 = vector.broadcast %425 : f32 to vector<8x128xf32>
    %427 = arith.select %424, %426, %422 : vector<8x128xi1>, vector<8x128xf32>
    %c19_i32_118 = arith.constant 19 : i32
    %428 = vector.broadcast %c19_i32_118 : i32 to vector<8x128xi32>
    %429 = arith.cmpi eq, %331, %428 : vector<8x128xi32>
    %c19_119 = arith.constant 19 : index
    %430 = memref.load %arg2[%c19_119] : memref<32xf32, #tpu.memory_space<smem>>
    %431 = vector.broadcast %430 : f32 to vector<8x128xf32>
    %432 = arith.select %429, %431, %427 : vector<8x128xi1>, vector<8x128xf32>
    %c20_i32_120 = arith.constant 20 : i32
    %433 = vector.broadcast %c20_i32_120 : i32 to vector<8x128xi32>
    %434 = arith.cmpi eq, %331, %433 : vector<8x128xi32>
    %c20_121 = arith.constant 20 : index
    %435 = memref.load %arg2[%c20_121] : memref<32xf32, #tpu.memory_space<smem>>
    %436 = vector.broadcast %435 : f32 to vector<8x128xf32>
    %437 = arith.select %434, %436, %432 : vector<8x128xi1>, vector<8x128xf32>
    %c21_i32_122 = arith.constant 21 : i32
    %438 = vector.broadcast %c21_i32_122 : i32 to vector<8x128xi32>
    %439 = arith.cmpi eq, %331, %438 : vector<8x128xi32>
    %c21_123 = arith.constant 21 : index
    %440 = memref.load %arg2[%c21_123] : memref<32xf32, #tpu.memory_space<smem>>
    %441 = vector.broadcast %440 : f32 to vector<8x128xf32>
    %442 = arith.select %439, %441, %437 : vector<8x128xi1>, vector<8x128xf32>
    %c22_i32_124 = arith.constant 22 : i32
    %443 = vector.broadcast %c22_i32_124 : i32 to vector<8x128xi32>
    %444 = arith.cmpi eq, %331, %443 : vector<8x128xi32>
    %c22_125 = arith.constant 22 : index
    %445 = memref.load %arg2[%c22_125] : memref<32xf32, #tpu.memory_space<smem>>
    %446 = vector.broadcast %445 : f32 to vector<8x128xf32>
    %447 = arith.select %444, %446, %442 : vector<8x128xi1>, vector<8x128xf32>
    %c23_i32_126 = arith.constant 23 : i32
    %448 = vector.broadcast %c23_i32_126 : i32 to vector<8x128xi32>
    %449 = arith.cmpi eq, %331, %448 : vector<8x128xi32>
    %c23_127 = arith.constant 23 : index
    %450 = memref.load %arg2[%c23_127] : memref<32xf32, #tpu.memory_space<smem>>
    %451 = vector.broadcast %450 : f32 to vector<8x128xf32>
    %452 = arith.select %449, %451, %447 : vector<8x128xi1>, vector<8x128xf32>
    %c24_i32_128 = arith.constant 24 : i32
    %453 = vector.broadcast %c24_i32_128 : i32 to vector<8x128xi32>
    %454 = arith.cmpi eq, %331, %453 : vector<8x128xi32>
    %c24_129 = arith.constant 24 : index
    %455 = memref.load %arg2[%c24_129] : memref<32xf32, #tpu.memory_space<smem>>
    %456 = vector.broadcast %455 : f32 to vector<8x128xf32>
    %457 = arith.select %454, %456, %452 : vector<8x128xi1>, vector<8x128xf32>
    %c25_i32_130 = arith.constant 25 : i32
    %458 = vector.broadcast %c25_i32_130 : i32 to vector<8x128xi32>
    %459 = arith.cmpi eq, %331, %458 : vector<8x128xi32>
    %c25_131 = arith.constant 25 : index
    %460 = memref.load %arg2[%c25_131] : memref<32xf32, #tpu.memory_space<smem>>
    %461 = vector.broadcast %460 : f32 to vector<8x128xf32>
    %462 = arith.select %459, %461, %457 : vector<8x128xi1>, vector<8x128xf32>
    %c26_i32_132 = arith.constant 26 : i32
    %463 = vector.broadcast %c26_i32_132 : i32 to vector<8x128xi32>
    %464 = arith.cmpi eq, %331, %463 : vector<8x128xi32>
    %c26_133 = arith.constant 26 : index
    %465 = memref.load %arg2[%c26_133] : memref<32xf32, #tpu.memory_space<smem>>
    %466 = vector.broadcast %465 : f32 to vector<8x128xf32>
    %467 = arith.select %464, %466, %462 : vector<8x128xi1>, vector<8x128xf32>
    %c27_i32_134 = arith.constant 27 : i32
    %468 = vector.broadcast %c27_i32_134 : i32 to vector<8x128xi32>
    %469 = arith.cmpi eq, %331, %468 : vector<8x128xi32>
    %c27_135 = arith.constant 27 : index
    %470 = memref.load %arg2[%c27_135] : memref<32xf32, #tpu.memory_space<smem>>
    %471 = vector.broadcast %470 : f32 to vector<8x128xf32>
    %472 = arith.select %469, %471, %467 : vector<8x128xi1>, vector<8x128xf32>
    %c28_i32_136 = arith.constant 28 : i32
    %473 = vector.broadcast %c28_i32_136 : i32 to vector<8x128xi32>
    %474 = arith.cmpi eq, %331, %473 : vector<8x128xi32>
    %c28_137 = arith.constant 28 : index
    %475 = memref.load %arg2[%c28_137] : memref<32xf32, #tpu.memory_space<smem>>
    %476 = vector.broadcast %475 : f32 to vector<8x128xf32>
    %477 = arith.select %474, %476, %472 : vector<8x128xi1>, vector<8x128xf32>
    %c29_i32_138 = arith.constant 29 : i32
    %478 = vector.broadcast %c29_i32_138 : i32 to vector<8x128xi32>
    %479 = arith.cmpi eq, %331, %478 : vector<8x128xi32>
    %c29_139 = arith.constant 29 : index
    %480 = memref.load %arg2[%c29_139] : memref<32xf32, #tpu.memory_space<smem>>
    %481 = vector.broadcast %480 : f32 to vector<8x128xf32>
    %482 = arith.select %479, %481, %477 : vector<8x128xi1>, vector<8x128xf32>
    %c30_i32_140 = arith.constant 30 : i32
    %483 = vector.broadcast %c30_i32_140 : i32 to vector<8x128xi32>
    %484 = arith.cmpi eq, %331, %483 : vector<8x128xi32>
    %c30_141 = arith.constant 30 : index
    %485 = memref.load %arg2[%c30_141] : memref<32xf32, #tpu.memory_space<smem>>
    %486 = vector.broadcast %485 : f32 to vector<8x128xf32>
    %487 = arith.select %484, %486, %482 : vector<8x128xi1>, vector<8x128xf32>
    %c31_i32_142 = arith.constant 31 : i32
    %488 = vector.broadcast %c31_i32_142 : i32 to vector<8x128xi32>
    %489 = arith.cmpi eq, %331, %488 : vector<8x128xi32>
    %c31_143 = arith.constant 31 : index
    %490 = memref.load %arg2[%c31_143] : memref<32xf32, #tpu.memory_space<smem>>
    %491 = vector.broadcast %490 : f32 to vector<8x128xf32>
    %492 = arith.select %489, %491, %487 : vector<8x128xi1>, vector<8x128xf32>
    %493 = arith.addf %329, %492 : vector<8x128xf32>
    %c0_144 = arith.constant 0 : index
    %c3_145 = arith.constant 3 : index
    %c0_146 = arith.constant 0 : index
    %c0_147 = arith.constant 0 : index
    %494 = vector.load %arg1[%c0_144, %c3_145, %c0_146, %c0_147] : memref<1x4x8x128xi32, #tpu.memory_space<vmem>>, vector<1x1x8x128xi32>
    %495 = vector.shape_cast %494 : vector<1x1x8x128xi32> to vector<8x128xi32>
    %cst_148 = arith.constant 0.000000e+00 : f32
    %496 = vector.broadcast %cst_148 : f32 to vector<8x128xf32>
    %c0_i32_149 = arith.constant 0 : i32
    %497 = vector.broadcast %c0_i32_149 : i32 to vector<8x128xi32>
    %498 = arith.cmpi eq, %495, %497 : vector<8x128xi32>
    %c0_150 = arith.constant 0 : index
    %499 = memref.load %arg2[%c0_150] : memref<32xf32, #tpu.memory_space<smem>>
    %500 = vector.broadcast %499 : f32 to vector<8x128xf32>
    %501 = arith.select %498, %500, %496 : vector<8x128xi1>, vector<8x128xf32>
    %c1_i32_151 = arith.constant 1 : i32
    %502 = vector.broadcast %c1_i32_151 : i32 to vector<8x128xi32>
    %503 = arith.cmpi eq, %495, %502 : vector<8x128xi32>
    %c1_152 = arith.constant 1 : index
    %504 = memref.load %arg2[%c1_152] : memref<32xf32, #tpu.memory_space<smem>>
    %505 = vector.broadcast %504 : f32 to vector<8x128xf32>
    %506 = arith.select %503, %505, %501 : vector<8x128xi1>, vector<8x128xf32>
    %c2_i32_153 = arith.constant 2 : i32
    %507 = vector.broadcast %c2_i32_153 : i32 to vector<8x128xi32>
    %508 = arith.cmpi eq, %495, %507 : vector<8x128xi32>
    %c2_154 = arith.constant 2 : index
    %509 = memref.load %arg2[%c2_154] : memref<32xf32, #tpu.memory_space<smem>>
    %510 = vector.broadcast %509 : f32 to vector<8x128xf32>
    %511 = arith.select %508, %510, %506 : vector<8x128xi1>, vector<8x128xf32>
    %c3_i32_155 = arith.constant 3 : i32
    %512 = vector.broadcast %c3_i32_155 : i32 to vector<8x128xi32>
    %513 = arith.cmpi eq, %495, %512 : vector<8x128xi32>
    %c3_156 = arith.constant 3 : index
    %514 = memref.load %arg2[%c3_156] : memref<32xf32, #tpu.memory_space<smem>>
    %515 = vector.broadcast %514 : f32 to vector<8x128xf32>
    %516 = arith.select %513, %515, %511 : vector<8x128xi1>, vector<8x128xf32>
    %c4_i32_157 = arith.constant 4 : i32
    %517 = vector.broadcast %c4_i32_157 : i32 to vector<8x128xi32>
    %518 = arith.cmpi eq, %495, %517 : vector<8x128xi32>
    %c4_158 = arith.constant 4 : index
    %519 = memref.load %arg2[%c4_158] : memref<32xf32, #tpu.memory_space<smem>>
    %520 = vector.broadcast %519 : f32 to vector<8x128xf32>
    %521 = arith.select %518, %520, %516 : vector<8x128xi1>, vector<8x128xf32>
    %c5_i32_159 = arith.constant 5 : i32
    %522 = vector.broadcast %c5_i32_159 : i32 to vector<8x128xi32>
    %523 = arith.cmpi eq, %495, %522 : vector<8x128xi32>
    %c5_160 = arith.constant 5 : index
    %524 = memref.load %arg2[%c5_160] : memref<32xf32, #tpu.memory_space<smem>>
    %525 = vector.broadcast %524 : f32 to vector<8x128xf32>
    %526 = arith.select %523, %525, %521 : vector<8x128xi1>, vector<8x128xf32>
    %c6_i32_161 = arith.constant 6 : i32
    %527 = vector.broadcast %c6_i32_161 : i32 to vector<8x128xi32>
    %528 = arith.cmpi eq, %495, %527 : vector<8x128xi32>
    %c6_162 = arith.constant 6 : index
    %529 = memref.load %arg2[%c6_162] : memref<32xf32, #tpu.memory_space<smem>>
    %530 = vector.broadcast %529 : f32 to vector<8x128xf32>
    %531 = arith.select %528, %530, %526 : vector<8x128xi1>, vector<8x128xf32>
    %c7_i32_163 = arith.constant 7 : i32
    %532 = vector.broadcast %c7_i32_163 : i32 to vector<8x128xi32>
    %533 = arith.cmpi eq, %495, %532 : vector<8x128xi32>
    %c7_164 = arith.constant 7 : index
    %534 = memref.load %arg2[%c7_164] : memref<32xf32, #tpu.memory_space<smem>>
    %535 = vector.broadcast %534 : f32 to vector<8x128xf32>
    %536 = arith.select %533, %535, %531 : vector<8x128xi1>, vector<8x128xf32>
    %c8_i32_165 = arith.constant 8 : i32
    %537 = vector.broadcast %c8_i32_165 : i32 to vector<8x128xi32>
    %538 = arith.cmpi eq, %495, %537 : vector<8x128xi32>
    %c8_166 = arith.constant 8 : index
    %539 = memref.load %arg2[%c8_166] : memref<32xf32, #tpu.memory_space<smem>>
    %540 = vector.broadcast %539 : f32 to vector<8x128xf32>
    %541 = arith.select %538, %540, %536 : vector<8x128xi1>, vector<8x128xf32>
    %c9_i32_167 = arith.constant 9 : i32
    %542 = vector.broadcast %c9_i32_167 : i32 to vector<8x128xi32>
    %543 = arith.cmpi eq, %495, %542 : vector<8x128xi32>
    %c9_168 = arith.constant 9 : index
    %544 = memref.load %arg2[%c9_168] : memref<32xf32, #tpu.memory_space<smem>>
    %545 = vector.broadcast %544 : f32 to vector<8x128xf32>
    %546 = arith.select %543, %545, %541 : vector<8x128xi1>, vector<8x128xf32>
    %c10_i32_169 = arith.constant 10 : i32
    %547 = vector.broadcast %c10_i32_169 : i32 to vector<8x128xi32>
    %548 = arith.cmpi eq, %495, %547 : vector<8x128xi32>
    %c10_170 = arith.constant 10 : index
    %549 = memref.load %arg2[%c10_170] : memref<32xf32, #tpu.memory_space<smem>>
    %550 = vector.broadcast %549 : f32 to vector<8x128xf32>
    %551 = arith.select %548, %550, %546 : vector<8x128xi1>, vector<8x128xf32>
    %c11_i32_171 = arith.constant 11 : i32
    %552 = vector.broadcast %c11_i32_171 : i32 to vector<8x128xi32>
    %553 = arith.cmpi eq, %495, %552 : vector<8x128xi32>
    %c11_172 = arith.constant 11 : index
    %554 = memref.load %arg2[%c11_172] : memref<32xf32, #tpu.memory_space<smem>>
    %555 = vector.broadcast %554 : f32 to vector<8x128xf32>
    %556 = arith.select %553, %555, %551 : vector<8x128xi1>, vector<8x128xf32>
    %c12_i32_173 = arith.constant 12 : i32
    %557 = vector.broadcast %c12_i32_173 : i32 to vector<8x128xi32>
    %558 = arith.cmpi eq, %495, %557 : vector<8x128xi32>
    %c12_174 = arith.constant 12 : index
    %559 = memref.load %arg2[%c12_174] : memref<32xf32, #tpu.memory_space<smem>>
    %560 = vector.broadcast %559 : f32 to vector<8x128xf32>
    %561 = arith.select %558, %560, %556 : vector<8x128xi1>, vector<8x128xf32>
    %c13_i32_175 = arith.constant 13 : i32
    %562 = vector.broadcast %c13_i32_175 : i32 to vector<8x128xi32>
    %563 = arith.cmpi eq, %495, %562 : vector<8x128xi32>
    %c13_176 = arith.constant 13 : index
    %564 = memref.load %arg2[%c13_176] : memref<32xf32, #tpu.memory_space<smem>>
    %565 = vector.broadcast %564 : f32 to vector<8x128xf32>
    %566 = arith.select %563, %565, %561 : vector<8x128xi1>, vector<8x128xf32>
    %c14_i32_177 = arith.constant 14 : i32
    %567 = vector.broadcast %c14_i32_177 : i32 to vector<8x128xi32>
    %568 = arith.cmpi eq, %495, %567 : vector<8x128xi32>
    %c14_178 = arith.constant 14 : index
    %569 = memref.load %arg2[%c14_178] : memref<32xf32, #tpu.memory_space<smem>>
    %570 = vector.broadcast %569 : f32 to vector<8x128xf32>
    %571 = arith.select %568, %570, %566 : vector<8x128xi1>, vector<8x128xf32>
    %c15_i32_179 = arith.constant 15 : i32
    %572 = vector.broadcast %c15_i32_179 : i32 to vector<8x128xi32>
    %573 = arith.cmpi eq, %495, %572 : vector<8x128xi32>
    %c15_180 = arith.constant 15 : index
    %574 = memref.load %arg2[%c15_180] : memref<32xf32, #tpu.memory_space<smem>>
    %575 = vector.broadcast %574 : f32 to vector<8x128xf32>
    %576 = arith.select %573, %575, %571 : vector<8x128xi1>, vector<8x128xf32>
    %c16_i32_181 = arith.constant 16 : i32
    %577 = vector.broadcast %c16_i32_181 : i32 to vector<8x128xi32>
    %578 = arith.cmpi eq, %495, %577 : vector<8x128xi32>
    %c16_182 = arith.constant 16 : index
    %579 = memref.load %arg2[%c16_182] : memref<32xf32, #tpu.memory_space<smem>>
    %580 = vector.broadcast %579 : f32 to vector<8x128xf32>
    %581 = arith.select %578, %580, %576 : vector<8x128xi1>, vector<8x128xf32>
    %c17_i32_183 = arith.constant 17 : i32
    %582 = vector.broadcast %c17_i32_183 : i32 to vector<8x128xi32>
    %583 = arith.cmpi eq, %495, %582 : vector<8x128xi32>
    %c17_184 = arith.constant 17 : index
    %584 = memref.load %arg2[%c17_184] : memref<32xf32, #tpu.memory_space<smem>>
    %585 = vector.broadcast %584 : f32 to vector<8x128xf32>
    %586 = arith.select %583, %585, %581 : vector<8x128xi1>, vector<8x128xf32>
    %c18_i32_185 = arith.constant 18 : i32
    %587 = vector.broadcast %c18_i32_185 : i32 to vector<8x128xi32>
    %588 = arith.cmpi eq, %495, %587 : vector<8x128xi32>
    %c18_186 = arith.constant 18 : index
    %589 = memref.load %arg2[%c18_186] : memref<32xf32, #tpu.memory_space<smem>>
    %590 = vector.broadcast %589 : f32 to vector<8x128xf32>
    %591 = arith.select %588, %590, %586 : vector<8x128xi1>, vector<8x128xf32>
    %c19_i32_187 = arith.constant 19 : i32
    %592 = vector.broadcast %c19_i32_187 : i32 to vector<8x128xi32>
    %593 = arith.cmpi eq, %495, %592 : vector<8x128xi32>
    %c19_188 = arith.constant 19 : index
    %594 = memref.load %arg2[%c19_188] : memref<32xf32, #tpu.memory_space<smem>>
    %595 = vector.broadcast %594 : f32 to vector<8x128xf32>
    %596 = arith.select %593, %595, %591 : vector<8x128xi1>, vector<8x128xf32>
    %c20_i32_189 = arith.constant 20 : i32
    %597 = vector.broadcast %c20_i32_189 : i32 to vector<8x128xi32>
    %598 = arith.cmpi eq, %495, %597 : vector<8x128xi32>
    %c20_190 = arith.constant 20 : index
    %599 = memref.load %arg2[%c20_190] : memref<32xf32, #tpu.memory_space<smem>>
    %600 = vector.broadcast %599 : f32 to vector<8x128xf32>
    %601 = arith.select %598, %600, %596 : vector<8x128xi1>, vector<8x128xf32>
    %c21_i32_191 = arith.constant 21 : i32
    %602 = vector.broadcast %c21_i32_191 : i32 to vector<8x128xi32>
    %603 = arith.cmpi eq, %495, %602 : vector<8x128xi32>
    %c21_192 = arith.constant 21 : index
    %604 = memref.load %arg2[%c21_192] : memref<32xf32, #tpu.memory_space<smem>>
    %605 = vector.broadcast %604 : f32 to vector<8x128xf32>
    %606 = arith.select %603, %605, %601 : vector<8x128xi1>, vector<8x128xf32>
    %c22_i32_193 = arith.constant 22 : i32
    %607 = vector.broadcast %c22_i32_193 : i32 to vector<8x128xi32>
    %608 = arith.cmpi eq, %495, %607 : vector<8x128xi32>
    %c22_194 = arith.constant 22 : index
    %609 = memref.load %arg2[%c22_194] : memref<32xf32, #tpu.memory_space<smem>>
    %610 = vector.broadcast %609 : f32 to vector<8x128xf32>
    %611 = arith.select %608, %610, %606 : vector<8x128xi1>, vector<8x128xf32>
    %c23_i32_195 = arith.constant 23 : i32
    %612 = vector.broadcast %c23_i32_195 : i32 to vector<8x128xi32>
    %613 = arith.cmpi eq, %495, %612 : vector<8x128xi32>
    %c23_196 = arith.constant 23 : index
    %614 = memref.load %arg2[%c23_196] : memref<32xf32, #tpu.memory_space<smem>>
    %615 = vector.broadcast %614 : f32 to vector<8x128xf32>
    %616 = arith.select %613, %615, %611 : vector<8x128xi1>, vector<8x128xf32>
    %c24_i32_197 = arith.constant 24 : i32
    %617 = vector.broadcast %c24_i32_197 : i32 to vector<8x128xi32>
    %618 = arith.cmpi eq, %495, %617 : vector<8x128xi32>
    %c24_198 = arith.constant 24 : index
    %619 = memref.load %arg2[%c24_198] : memref<32xf32, #tpu.memory_space<smem>>
    %620 = vector.broadcast %619 : f32 to vector<8x128xf32>
    %621 = arith.select %618, %620, %616 : vector<8x128xi1>, vector<8x128xf32>
    %c25_i32_199 = arith.constant 25 : i32
    %622 = vector.broadcast %c25_i32_199 : i32 to vector<8x128xi32>
    %623 = arith.cmpi eq, %495, %622 : vector<8x128xi32>
    %c25_200 = arith.constant 25 : index
    %624 = memref.load %arg2[%c25_200] : memref<32xf32, #tpu.memory_space<smem>>
    %625 = vector.broadcast %624 : f32 to vector<8x128xf32>
    %626 = arith.select %623, %625, %621 : vector<8x128xi1>, vector<8x128xf32>
    %c26_i32_201 = arith.constant 26 : i32
    %627 = vector.broadcast %c26_i32_201 : i32 to vector<8x128xi32>
    %628 = arith.cmpi eq, %495, %627 : vector<8x128xi32>
    %c26_202 = arith.constant 26 : index
    %629 = memref.load %arg2[%c26_202] : memref<32xf32, #tpu.memory_space<smem>>
    %630 = vector.broadcast %629 : f32 to vector<8x128xf32>
    %631 = arith.select %628, %630, %626 : vector<8x128xi1>, vector<8x128xf32>
    %c27_i32_203 = arith.constant 27 : i32
    %632 = vector.broadcast %c27_i32_203 : i32 to vector<8x128xi32>
    %633 = arith.cmpi eq, %495, %632 : vector<8x128xi32>
    %c27_204 = arith.constant 27 : index
    %634 = memref.load %arg2[%c27_204] : memref<32xf32, #tpu.memory_space<smem>>
    %635 = vector.broadcast %634 : f32 to vector<8x128xf32>
    %636 = arith.select %633, %635, %631 : vector<8x128xi1>, vector<8x128xf32>
    %c28_i32_205 = arith.constant 28 : i32
    %637 = vector.broadcast %c28_i32_205 : i32 to vector<8x128xi32>
    %638 = arith.cmpi eq, %495, %637 : vector<8x128xi32>
    %c28_206 = arith.constant 28 : index
    %639 = memref.load %arg2[%c28_206] : memref<32xf32, #tpu.memory_space<smem>>
    %640 = vector.broadcast %639 : f32 to vector<8x128xf32>
    %641 = arith.select %638, %640, %636 : vector<8x128xi1>, vector<8x128xf32>
    %c29_i32_207 = arith.constant 29 : i32
    %642 = vector.broadcast %c29_i32_207 : i32 to vector<8x128xi32>
    %643 = arith.cmpi eq, %495, %642 : vector<8x128xi32>
    %c29_208 = arith.constant 29 : index
    %644 = memref.load %arg2[%c29_208] : memref<32xf32, #tpu.memory_space<smem>>
    %645 = vector.broadcast %644 : f32 to vector<8x128xf32>
    %646 = arith.select %643, %645, %641 : vector<8x128xi1>, vector<8x128xf32>
    %c30_i32_209 = arith.constant 30 : i32
    %647 = vector.broadcast %c30_i32_209 : i32 to vector<8x128xi32>
    %648 = arith.cmpi eq, %495, %647 : vector<8x128xi32>
    %c30_210 = arith.constant 30 : index
    %649 = memref.load %arg2[%c30_210] : memref<32xf32, #tpu.memory_space<smem>>
    %650 = vector.broadcast %649 : f32 to vector<8x128xf32>
    %651 = arith.select %648, %650, %646 : vector<8x128xi1>, vector<8x128xf32>
    %c31_i32_211 = arith.constant 31 : i32
    %652 = vector.broadcast %c31_i32_211 : i32 to vector<8x128xi32>
    %653 = arith.cmpi eq, %495, %652 : vector<8x128xi32>
    %c31_212 = arith.constant 31 : index
    %654 = memref.load %arg2[%c31_212] : memref<32xf32, #tpu.memory_space<smem>>
    %655 = vector.broadcast %654 : f32 to vector<8x128xf32>
    %656 = arith.select %653, %655, %651 : vector<8x128xi1>, vector<8x128xf32>
    %657 = arith.addf %493, %656 : vector<8x128xf32>
    %c0_213 = arith.constant 0 : index
    %c0_214 = arith.constant 0 : index
    %c0_215 = arith.constant 0 : index
    %658 = vector.load %arg4[%c0_213, %c0_214, %c0_215] : memref<1x8x128xf32, #tpu.memory_space<vmem>>, vector<1x8x128xf32>
    %659 = vector.shape_cast %658 : vector<1x8x128xf32> to vector<8x128xf32>
    %660 = vector.shape_cast %657 : vector<8x128xf32> to vector<1x8x128xf32>
    tpu.vector_store %arg4[%c0_213, %c0_214, %c0_215], %660 {strides = array<i32>} : memref<1x8x128xf32, #tpu.memory_space<vmem>>, vector<1x8x128xf32>,
    return
  }
  func.func @transform_0(%arg0: i32) -> (i32, i32, i32, i32) {
    %c0_i32 = arith.constant 0 : i32
    %c0_i32_0 = arith.constant 0 : i32
    %c0_i32_1 = arith.constant 0 : i32
    %c0_i32_2 = arith.constant 0 : i32
    return %arg0, %c0_i32, %c0_i32_0, %c0_i32_1 : i32, i32, i32, i32
  }
  func.func @transform_1(%arg0: i32) -> i32 {
    %c0_i32 = arith.constant 0 : i32
    %c0_i32_0 = arith.constant 0 : i32
    return %c0_i32 : i32
  }
  func.func @transform_2(%arg0: i32) -> (i32, i32) {
    %c0_i32 = arith.constant 0 : i32
    %c0_i32_0 = arith.constant 0 : i32
    %c0_i32_1 = arith.constant 0 : i32
    return %c0_i32, %c0_i32_0 : i32, i32
  }
  func.func @transform_3(%arg0: i32) -> (i32, i32, i32) {
    %c0_i32 = arith.constant 0 : i32
    %c0_i32_0 = arith.constant 0 : i32
    %c0_i32_1 = arith.constant 0 : i32
    return %arg0, %c0_i32, %c0_i32_0 : i32, i32, i32
  }
}

</mosaic_0001>

<bundles_post_ra>
// kernel: tpu_custom_call.1
= control target key start
LH: loop header
LB: loop body
LE: loop exit
PB: predicated region body
PF: predicated region fallthrough
CT: control target
= control target key end

     0   :  { %9 = vsyncpa [#allocation4], 0  ;;  %s206_s0 = inlined_call_operand.hbm [shape: s32[1,4,8,128], index: 0, kind: input, shape index: {}]   ;;  %s207_s1 = inlined_call_operand.vmem [shape: f32[1,128], index: 1, kind: input, shape index: {}]   ;;  %s208_s2 = inlined_call_operand.<no memory space> [shape: f32[1,1], index: 2, kind: input, shape index: {}]   ;;  %s209_s3 = inlined_call_operand.hbm [shape: f32[1,8,128], index: 3, kind: output, shape index: {}]  }
   0x1   :  { %10 = vsyncpa [#allocation5], 0  ;;  %s152_s12 = smov [#allocation3]   ;;  %s104_s16 = scalar_lea.hbm %s206_s0, 512 }
   0x2   :  { %s16_s13 = sshll.u32 %s152_s12, 4  ;;  %p105_p0 = scmp.ne.s32.totalorder %s206_s0, %s104_s16  ;;  %s17_s13 = int_to_ptr.vmem [resolvable:$true] %s16_s13 }
   0x3   :  { %p108_p1 = scmp.lt.u32.totalorder %s104_s16, %s206_s0 }
   0x5   :  { %p110_p2 = pnand %p108_p1, %p105_p0 }
   0x7   :  { %113 = shalt.err (!%p110_p2)
}
   0x8   :  { %s114_s21 = scalar_lea.vmem %s17_s13, 512  ;;  %p119_p4 = scmp.lt.s32.totalorder %s17_s13, %s17_s13 }
   0x9   :  { %p115_p3 = scmp.ne.s32.totalorder %s17_s13, %s114_s21  ;;  %p120_p5 = scmp.lt.s32.totalorder %s114_s21, %s114_s21 }
   0xb   :  { %p121_p6 = por %p120_p5, %p119_p4 }
   0xd   :  { %p122_p7 = pnand %p121_p6, %p115_p3 }
   0xf   :  { %125 = shalt.err (!%p122_p7)
}
  0x10   :  { %s153_s22 = smov 128   ;;  %s154_s23 = smov 8  }
  0x11   :  { %22 = dma.hbm_to_vmem [thread:$0]  %s206_s0, 512, %s17_s13, [#allocation4], %s153_s22, %s153_s22, %s154_s23  }
  0x12   :  { %148 = dma.done.wait [#allocation4], 512  }
  0x13   :  { %149 = vsyncadd [#allocation4], 4294966784  ;;  %v33_v0 = vld [vmem:[#allocation3] sm:$0xff]  ;;  %v37_v1 = vld [vmem:[#allocation3 + $0x10] sm:$0xff]  ;;  %v31_v13 = vstv %s208_s2 }
  0x14   :  { %vm46_vm0 = vcmp.gt.s32.totalorder %v33_v0, 0  ;;  %vm62_vm1 = vcmp.gt.s32.totalorder %v37_v1, 0  ;;  %v35_v2 = vld [vmem:[#allocation3 + $0x8] sm:$0xff]  ;;  %v39_v3 = vld [vmem:[#allocation3 + $0x18] sm:$0xff]  ;;  %v94_v10 = vld [vmem:[%s207_s1] ss:$0 sm:$0xff] }
  0x15   :  { %v47_v4 = vsel %vm46_vm0, %v33_v0, 0  ;;  %v63_v5 = vsel %vm62_vm1, %v37_v1, 0  ;;  %vm54_vm2 = vcmp.gt.s32.totalorder %v35_v2, 0  ;;  %vm70_vm3 = vcmp.gt.s32.totalorder %v39_v3, 0  ;;  %s155_s1 = smov [#allocation6]  }
  0x16   :  { %vm48_vm4 = vcmp.lt.s32.totalorder %v47_v4, 127  ;;  %vm64_vm5 = vcmp.lt.s32.totalorder %v63_v5, 127  ;;  %v55_v8 = vsel %vm54_vm2, %v35_v2, 0  ;;  %v71_v9 = vsel %vm70_vm3, %v39_v3, 0  ;;  %s85_s29 = sshll.u32 %s155_s1, 4  ;;  %s86_s29 = int_to_ptr.vmem [resolvable:$true] %s85_s29 }
  0x17   :  { %v49_v6 = vsel %vm48_vm4, %v47_v4, 127  ;;  %v65_v7 = vsel %vm64_vm5, %v63_v5, 127  ;;  %vm56_vm6 = vcmp.lt.s32.totalorder %v55_v8, 127  ;;  %vm72_vm7 = vcmp.lt.s32.totalorder %v71_v9, 127  ;;  %s126_s30 = scalar_lea.vmem %s86_s29, 128  ;;  %p131_p9 = scmp.lt.s32.totalorder %s86_s29, %s86_s29 }
  0x18   :  { %99 = vset.pattern.permute.xlu0 %v49_v6  ;;  %101 = vset.pattern.permute.xlu1 %v65_v7  ;;  %v57_v11 = vsel %vm56_vm6, %v55_v8, 127  ;;  %v73_v12 = vsel %vm72_vm7, %v71_v9, 127  ;;  %p127_p8 = scmp.ne.s32.totalorder %s86_s29, %s126_s30  ;;  %p132_p10 = scmp.lt.s32.totalorder %s126_s30, %s126_s30 }
  0x1a   :  { %p133_p11 = por %p132_p10, %p131_p9 }
  0x1c   :  { %51 = vperm.xlu0 %99, %v94_v10   ;;  %67 = vperm.xlu1 %101, %v94_v10   ;;  %p134_p12 = pnand %p133_p11, %p127_p8 }
  0x20   :  { %100 = vset.pattern.permute.xlu0 %v57_v11  ;;  %102 = vset.pattern.permute.xlu1 %v73_v12 }
  0x24   :  { %59 = vperm.xlu0 %100, %v94_v10   ;;  %75 = vperm.xlu1 %102, %v94_v10  }
  0x28   :  { %103 = vset.pattern.permute.xlu0 %v73_v12 }
  0x9b   :  { %v52_v14 = vpop.permute.xlu0 %51  ;;  %v68_v15 = vpop.permute.xlu1 %67 }
  0x9c   :  { %v53_v16 = vadd.f32 %v52_v14, %v31_v13 }
  0xa3   :  { %v60_v17 = vpop.permute.xlu0 %59  ;;  %v76_v19 = vpop.permute.xlu1 %75 }
  0xa4   :  { %v61_v18 = vadd.f32 %v60_v17, %v53_v16 }
  0xa6   :  { %v69_v20 = vadd.f32 %v68_v15, %v61_v18 }
  0xa8   :  { %v77_v21 = vadd.f32 %v76_v19, %v69_v20 }
  0xaa   :  { %78 = vst [vmem:[#allocation6] sm:$0xff] %v77_v21 }
  0xab   :  { %137 = shalt.err (!%p134_p12)
}
  0xac   :  { %s138_s5 = scalar_lea.hbm %s209_s3, 128 }
  0xad   :  { %p139_p13 = scmp.ne.s32.totalorder %s209_s3, %s138_s5  ;;  %p142_p0 = scmp.lt.u32.totalorder %s138_s5, %s209_s3 }
  0xaf   :  { %p144_p1 = pnand %p142_p0, %p139_p13 }
  0xb1   :  { %147 = shalt.err (!%p144_p1)
}
  0xb2   :  { %88 = dma.vmem_to_hbm [thread:$0]  %s86_s29, 128, %s209_s3, [#allocation5]  }
  0xb3   :  { %150 = dma.done.wait [#allocation5], 128  }
  0xb4   :  { %151 = vsyncadd [#allocation5], 4294967168 }
  0xb5   :  { %92 = vsyncpa [#allocation4], 1 }
  0xb6   :  { %93 = vsyncpa [#allocation5], 1 }

// kernel: tpu_custom_call.1
= control target key start
LH: loop header
LB: loop body
LE: loop exit
PB: predicated region body
PF: predicated region fallthrough
CT: control target
= control target key end

     0   :  { %9 = vsyncpa [#allocation4], 0  ;;  %s978_s0 = inlined_call_operand.hbm [shape: s32[1,4,8,128], index: 0, kind: input, shape index: {}]   ;;  %s979_s1 = inlined_call_operand.vmem [shape: f32[32], index: 1, kind: input, shape index: {}]   ;;  %s980_s2 = inlined_call_operand.<no memory space> [shape: f32[1,1], index: 2, kind: input, shape index: {}]   ;;  %s981_s3 = inlined_call_operand.hbm [shape: f32[1,8,128], index: 3, kind: output, shape index: {}]  }
   0x1   :  { %10 = vsyncpa [#allocation6], 0 }
   0x2   :  { %11 = vsyncpa [#allocation5], 0  ;;  %s491_s12 = smov [#allocation3]   ;;  %s30_s16 = sshll.u32 %s979_s1, 4  ;;  %s31_s16 = int_to_ptr.vmem [resolvable:$true] %s30_s16 }
   0x3   :  { %s17_s13 = sshll.u32 %s491_s12, 4  ;;  %s429_s19 = scalar_lea.hbm %s978_s0, 512  ;;  %s18_s13 = int_to_ptr.vmem [resolvable:$true] %s17_s13 }
   0x4   :  { %p430_p0 = scmp.ne.s32.totalorder %s978_s0, %s429_s19  ;;  %p433_p1 = scmp.lt.u32.totalorder %s429_s19, %s978_s0 }
   0x6   :  { %p435_p2 = pnand %p433_p1, %p430_p0 }
   0x8   :  { %438 = shalt.err (!%p435_p2)
}
   0x9   :  { %s439_s24 = scalar_lea.vmem %s18_s13, 512  ;;  %p444_p4 = scmp.lt.s32.totalorder %s18_s13, %s18_s13 }
   0xa   :  { %p440_p3 = scmp.ne.s32.totalorder %s18_s13, %s439_s24  ;;  %p445_p5 = scmp.lt.s32.totalorder %s439_s24, %s439_s24 }
   0xc   :  { %p446_p6 = por %p445_p5, %p444_p4 }
   0xe   :  { %p447_p7 = pnand %p446_p6, %p440_p3 }
  0x10   :  { %450 = shalt.err (!%p447_p7)
}
  0x11   :  { %s492_s1 = smov 128   ;;  %s493_s25 = smov 8  }
  0x12   :  { %23 = dma.hbm_to_vmem [thread:$0]  %s978_s0, 512, %s18_s13, [#allocation4], %s492_s1, %s492_s1, %s493_s25  }
  0x13   :  { %s451_s28 = scalar_lea.vmem %s31_s16, 16  ;;  %p456_p9 = scmp.lt.s32.totalorder %s31_s16, %s31_s16 }
  0x14   :  { %p452_p8 = scmp.ne.s32.totalorder %s31_s16, %s451_s28  ;;  %p457_p10 = scmp.lt.s32.totalorder %s451_s28, %s451_s28 }
  0x16   :  { %p458_p11 = por %p457_p10, %p456_p9 }
  0x18   :  { %p459_p12 = pnand %p458_p11, %p452_p8 }
  0x1a   :  { %462 = shalt.err (!%p459_p12)
}
  0x1b   :  { %s494_s29 = smov [#allocation7]  }
  0x1c   :  { %33 = dma.vmem_to_smem %s31_s16, 16, %s494_s29, [#allocation6]  }
  0x1d   :  { %485 = dma.done.wait [#allocation4], 512  }
  0x1e   :  { %486 = vsyncadd [#allocation4], 4294966784 }
  0x1f   :  { %487 = dma.done.wait [#allocation6], 16  }
  0x20   :  { %488 = vsyncadd [#allocation6], 4294967280 }
  0x21   :  { %42 = sfence }
  0x22   :  { %s47_s30 = sld [smem:[#allocation7]]  ;;  %s393_s4 = sld [smem:[#allocation7 + $0x1]]  ;;  %v531_v0 = vld [vmem:[#allocation3] sm:$0xff]  ;;  %v637_v32 = vld [vmem:[#allocation3 + $0x8] sm:$0xff] }
  0x23   :  { %s394_s0 = sld [smem:[#allocation7 + $0x2]]  ;;  %s395_s5 = sld [smem:[#allocation7 + $0x3]]  ;;  %vm46_vm0 = vcmp.eq.s32.totalorder %v531_v0, 0  ;;  %vm50_vm1 = vcmp.eq.s32.totalorder %v531_v0, 1  ;;  %vm54_vm2 = vcmp.eq.s32.totalorder %v531_v0, 2  ;;  %vm58_vm3 = vcmp.eq.s32.totalorder %v531_v0, 3 }
  0x24   :  { %s396_s6 = sld [smem:[#allocation7 + $0x4]]  ;;  %s397_s7 = sld [smem:[#allocation7 + $0x5]]  ;;  %vm62_vm4 = vcmp.eq.s32.totalorder %v531_v0, 4  ;;  %vm66_vm5 = vcmp.eq.s32.totalorder %v531_v0, 5  ;;  %vm70_vm6 = vcmp.eq.s32.totalorder %v531_v0, 6  ;;  %vm74_vm7 = vcmp.eq.s32.totalorder %v531_v0, 7 }
  0x25   :  { %s398_s8 = sld [smem:[#allocation7 + $0x6]]  ;;  %s399_s9 = sld [smem:[#allocation7 + $0x7]]  ;;  %vm78_vm8 = vcmp.eq.s32.totalorder %v531_v0, 8  ;;  %vm82_vm9 = vcmp.eq.s32.totalorder %v531_v0, 9  ;;  %vm86_vm10 = vcmp.eq.s32.totalorder %v531_v0, 10  ;;  %vm90_vm11 = vcmp.eq.s32.totalorder %v531_v0, 11 }
  0x26   :  { %s400_s10 = sld [smem:[#allocation7 + $0x8]]  ;;  %s535_s11 = sld [smem:[#allocation7 + $0x9]]  ;;  %vm94_vm12 = vcmp.eq.s32.totalorder %v531_v0, 12  ;;  %vm98_vm13 = vcmp.eq.s32.totalorder %v531_v0, 13  ;;  %vm102_vm14 = vcmp.eq.s32.totalorder %v531_v0, 14  ;;  %vm106_vm15 = vcmp.eq.s32.totalorder %v531_v0, 15 }
  0x27   :  { %s542_s12 = sld [smem:[#allocation7 + $0xa]]  ;;  %s548_s13 = sld [smem:[#allocation7 + $0xb]] }
  0x28   :  { %v537_v1 = vstv %s47_s30  ;;  %v539_v2 = vstv %s393_s4  ;;  %s556_s14 = sld [smem:[#allocation7 + $0xc]]  ;;  %s562_s15 = sld [smem:[#allocation7 + $0xd]] }
  0x29   :  { %v49_v3 = vsel %vm46_vm0, %v537_v1, 0.0  ;;  %v545_v4 = vstv %s394_s0  ;;  %v551_v6 = vstv %s395_s5  ;;  %s568_s16 = sld [smem:[#allocation7 + $0xe]]  ;;  %s574_s17 = sld [smem:[#allocation7 + $0xf]]  ;;  %vm110_vm0 = vcmp.eq.s32.totalorder %v531_v0, 16 }
  0x2a   :  { %v53_v5 = vsel %vm50_vm1, %v539_v2, %v49_v3  ;;  %v554_v7 = vstv %s396_s6  ;;  %v560_v9 = vstv %s397_s7  ;;  %s580_s18 = sld [smem:[#allocation7 + $0x10]]  ;;  %s587_s19 = sld [smem:[#allocation7 + $0x11]]  ;;  %vm114_vm1 = vcmp.eq.s32.totalorder %v531_v0, 17 }
  0x2b   :  { %v57_v8 = vsel %vm54_vm2, %v545_v4, %v53_v5  ;;  %v566_v11 = vstv %s398_s8  ;;  %v572_v13 = vstv %s399_s9  ;;  %s594_s20 = sld [smem:[#allocation7 + $0x12]]  ;;  %s596_s21 = sld [smem:[#allocation7 + $0x13]]  ;;  %vm118_vm2 = vcmp.eq.s32.totalorder %v531_v0, 18 }
  0x2c   :  { %v61_v10 = vsel %vm58_vm3, %v551_v6, %v57_v8  ;;  %v578_v15 = vstv %s400_s10  ;;  %v585_v17 = vstv %s535_s11  ;;  %s603_s22 = sld [smem:[#allocation7 + $0x14]]  ;;  %s615_s23 = sld [smem:[#allocation7 + $0x15]]  ;;  %vm122_vm3 = vcmp.eq.s32.totalorder %v531_v0, 19  ;;  %v733_v8 = vld [vmem:[#allocation3 + $0x10] sm:$0xff] }
  0x2d   :  { %v65_v12 = vsel %vm62_vm4, %v554_v7, %v61_v10  ;;  %v592_v19 = vstv %s542_s12  ;;  %v601_v21 = vstv %s548_s13  ;;  %s623_s24 = sld [smem:[#allocation7 + $0x16]]  ;;  %vm126_vm4 = vcmp.eq.s32.totalorder %v531_v0, 20  ;;  %s645_s1 = sld [smem:[#allocation7 + $0x17]] }
  0x2e   :  { %v69_v14 = vsel %vm66_vm5, %v560_v9, %v65_v12  ;;  %v608_v23 = vstv %s556_s14  ;;  %v613_v25 = vstv %s562_s15  ;;  %vm130_vm5 = vcmp.eq.s32.totalorder %v531_v0, 21  ;;  %s668_s25 = sld [smem:[#allocation7 + $0x18]]  ;;  %s417_s26 = sld [smem:[#allocation7 + $0x19]] }
  0x2f   :  { %v73_v16 = vsel %vm70_vm6, %v566_v11, %v69_v14  ;;  %v620_v27 = vstv %s568_s16  ;;  %v627_v29 = vstv %s574_s17  ;;  %vm134_vm6 = vcmp.eq.s32.totalorder %v531_v0, 22  ;;  %s418_s27 = sld [smem:[#allocation7 + $0x1a]]  ;;  %s729_s28 = sld [smem:[#allocation7 + $0x1b]] }
  0x30   :  { %v77_v18 = vsel %vm74_vm7, %v572_v13, %v73_v16  ;;  %v633_v31 = vstv %s580_s18  ;;  %v641_v34 = vstv %s587_s19  ;;  %vm177_vm7 = vcmp.eq.s32.totalorder %v637_v32, 0  ;;  %s753_s29 = sld [smem:[#allocation7 + $0x1c]]  ;;  %s759_s30 = sld [smem:[#allocation7 + $0x1d]] }
  0x31   :  { %v81_v20 = vsel %vm78_vm8, %v578_v15, %v77_v18  ;;  %v651_v36 = vstv %s594_s20  ;;  %v654_v37 = vstv %s596_s21  ;;  %vm179_vm8 = vcmp.eq.s32.totalorder %v637_v32, 1  ;;  %s774_s4 = sld [smem:[#allocation7 + $0x1e]]  ;;  %s874_s0 = sld [smem:[#allocation7 + $0x1f]] }
  0x32   :  { %v85_v22 = vsel %vm82_vm9, %v585_v17, %v81_v20  ;;  %v661_v39 = vstv %s603_s22  ;;  %v178_v41 = vsel %vm177_vm7, %v537_v1, 0.0  ;;  %vm181_vm9 = vcmp.eq.s32.totalorder %v637_v32, 2 }
  0x33   :  { %v89_v24 = vsel %vm86_vm10, %v592_v19, %v85_v22  ;;  %vm183_vm10 = vcmp.eq.s32.totalorder %v637_v32, 3  ;;  %v677_v43 = vstv %s615_s23  ;;  %v180_v44 = vsel %vm179_vm8, %v539_v2, %v178_v41 }
  0x34   :  { %v93_v26 = vsel %vm90_vm11, %v601_v21, %v89_v24  ;;  %vm185_vm11 = vcmp.eq.s32.totalorder %v637_v32, 4  ;;  %v685_v46 = vstv %s623_s24  ;;  %v182_v47 = vsel %vm181_vm9, %v545_v4, %v180_v44 }
  0x35   :  { %v97_v28 = vsel %vm94_vm12, %v608_v23, %v93_v26  ;;  %vm187_vm12 = vcmp.eq.s32.totalorder %v637_v32, 5  ;;  %v184_v49 = vsel %vm183_vm10, %v551_v6, %v182_v47  ;;  %v704_v53 = vstv %s645_s1 }
  0x36   :  { %v101_v30 = vsel %vm98_vm13, %v613_v25, %v97_v28  ;;  %vm189_vm13 = vcmp.eq.s32.totalorder %v637_v32, 6  ;;  %v186_v51 = vsel %vm185_vm11, %v554_v7, %v184_v49  ;;  %v715_v58 = vstv %s668_s25 }
  0x37   :  { %v105_v33 = vsel %vm102_vm14, %v620_v27, %v101_v30  ;;  %vm138_vm14 = vcmp.eq.s32.totalorder %v531_v0, 23  ;;  %v188_v54 = vsel %vm187_vm12, %v560_v9, %v186_v51  ;;  %vm203_vm7 = vcmp.eq.s32.totalorder %v637_v32, 13 }
  0x38   :  { %v109_v35 = vsel %vm106_vm15, %v627_v29, %v105_v33  ;;  %vm191_vm15 = vcmp.eq.s32.totalorder %v637_v32, 7  ;;  %v190_v55 = vsel %vm189_vm13, %v566_v11, %v188_v54  ;;  %v725_v63 = vstv %s417_s26 }
  0x39   :  { %v113_v38 = vsel %vm110_vm0, %v633_v31, %v109_v35  ;;  %vm193_vm0 = vcmp.eq.s32.totalorder %v637_v32, 8  ;;  %v192_v56 = vsel %vm191_vm15, %v572_v13, %v190_v55  ;;  %vm205_vm8 = vcmp.eq.s32.totalorder %v637_v32, 14 }
  0x3a   :  { %v117_v40 = vsel %vm114_vm1, %v641_v34, %v113_v38  ;;  %vm195_vm1 = vcmp.eq.s32.totalorder %v637_v32, 9  ;;  %v194_v59 = vsel %vm193_vm0, %v578_v15, %v192_v56  ;;  %vm207_vm9 = vcmp.eq.s32.totalorder %v637_v32, 15 }
  0x3b   :  { %v121_v42 = vsel %vm118_vm2, %v651_v36, %v117_v40  ;;  %vm142_vm2 = vcmp.eq.s32.totalorder %v531_v0, 24  ;;  %v196_v60 = vsel %vm195_vm1, %v585_v17, %v194_v59  ;;  %vm150_vm10 = vcmp.eq.s32.totalorder %v531_v0, 26 }
  0x3c   :  { %v125_v45 = vsel %vm122_vm3, %v654_v37, %v121_v42  ;;  %vm197_vm3 = vcmp.eq.s32.totalorder %v637_v32, 10  ;;  %v736_v10 = vstv %s418_s27  ;;  %vm209_vm11 = vcmp.eq.s32.totalorder %v637_v32, 16 }
  0x3d   :  { %v129_v48 = vsel %vm126_vm4, %v661_v39, %v125_v45  ;;  %vm199_vm4 = vcmp.eq.s32.totalorder %v637_v32, 11  ;;  %v198_v61 = vsel %vm197_vm3, %v592_v19, %v196_v60  ;;  %vm154_vm12 = vcmp.eq.s32.totalorder %v531_v0, 27 }
  0x3e   :  { %v133_v50 = vsel %vm130_vm5, %v677_v43, %v129_v48  ;;  %vm201_vm5 = vcmp.eq.s32.totalorder %v637_v32, 12  ;;  %v200_v3 = vsel %vm199_vm4, %v601_v21, %v198_v61  ;;  %vm211_vm13 = vcmp.eq.s32.totalorder %v637_v32, 17 }
  0x3f   :  { %v137_v52 = vsel %vm134_vm6, %v685_v46, %v133_v50  ;;  %vm146_vm6 = vcmp.eq.s32.totalorder %v531_v0, 25  ;;  %v202_v5 = vsel %vm201_vm5, %v608_v23, %v200_v3  ;;  %vm215_vm15 = vcmp.eq.s32.totalorder %v637_v32, 19 }
  0x40   :  { %v141_v57 = vsel %vm138_vm14, %v704_v53, %v137_v52  ;;  %v204_v12 = vsel %vm203_vm7, %v613_v25, %v202_v5  ;;  %vm213_vm14 = vcmp.eq.s32.totalorder %v637_v32, 18  ;;  %vm244_vm0 = vcmp.eq.s32.totalorder %v733_v8, 0  ;;  %v823_v5 = vld [vmem:[#allocation3 + $0x18] sm:$0xff] }
  0x41   :  { %v145_v62 = vsel %vm142_vm2, %v715_v58, %v141_v57  ;;  %v206_v16 = vsel %vm205_vm8, %v620_v27, %v204_v12  ;;  %vm246_vm1 = vcmp.eq.s32.totalorder %v733_v8, 1  ;;  %v245_v22 = vsel %vm244_vm0, %v537_v1, 0.0 }
  0x42   :  { %v149_v14 = vsel %vm146_vm6, %v725_v63, %v145_v62  ;;  %v208_v18 = vsel %vm207_vm9, %v627_v29, %v206_v16  ;;  %vm248_vm2 = vcmp.eq.s32.totalorder %v733_v8, 2  ;;  %vm250_vm3 = vcmp.eq.s32.totalorder %v733_v8, 3 }
  0x43   :  { %v210_v20 = vsel %vm209_vm11, %v633_v31, %v208_v18  ;;  %vm217_vm4 = vcmp.eq.s32.totalorder %v637_v32, 20  ;;  %v247_v26 = vsel %vm246_vm1, %v539_v2, %v245_v22  ;;  %vm252_vm5 = vcmp.eq.s32.totalorder %v733_v8, 4 }
  0x44   :  { %v212_v24 = vsel %vm211_vm13, %v641_v34, %v210_v20  ;;  %vm219_vm6 = vcmp.eq.s32.totalorder %v637_v32, 21  ;;  %v249_v30 = vsel %vm248_vm2, %v545_v4, %v247_v26  ;;  %vm254_vm7 = vcmp.eq.s32.totalorder %v733_v8, 5 }
  0x45   :  { %v214_v28 = vsel %vm213_vm14, %v651_v36, %v212_v24  ;;  %vm221_vm8 = vcmp.eq.s32.totalorder %v637_v32, 22  ;;  %v251_v35 = vsel %vm250_vm3, %v551_v6, %v249_v30  ;;  %vm256_vm9 = vcmp.eq.s32.totalorder %v733_v8, 6 }
  0x46   :  { %v216_v33 = vsel %vm215_vm15, %v654_v37, %v214_v28  ;;  %v772_v38 = vstv %s729_s28  ;;  %v253_v41 = vsel %vm252_vm5, %v554_v7, %v251_v35  ;;  %vm258_vm11 = vcmp.eq.s32.totalorder %v733_v8, 7 }
  0x47   :  { %v218_v40 = vsel %vm217_vm4, %v661_v39, %v216_v33  ;;  %vm223_vm13 = vcmp.eq.s32.totalorder %v637_v32, 23  ;;  %v255_v44 = vsel %vm254_vm7, %v560_v9, %v253_v41  ;;  %vm260_vm14 = vcmp.eq.s32.totalorder %v733_v8, 8 }
  0x48   :  { %v220_v42 = vsel %vm219_vm6, %v677_v43, %v218_v40  ;;  %v153_v45 = vsel %vm150_vm10, %v736_v10, %v149_v14  ;;  %v257_v48 = vsel %vm256_vm9, %v566_v11, %v255_v44  ;;  %vm262_vm15 = vcmp.eq.s32.totalorder %v733_v8, 9 }
  0x49   :  { %v222_v47 = vsel %vm221_vm8, %v685_v46, %v220_v42  ;;  %vm158_vm0 = vcmp.eq.s32.totalorder %v531_v0, 28  ;;  %v259_v49 = vsel %vm258_vm11, %v572_v13, %v257_v48  ;;  %vm264_vm1 = vcmp.eq.s32.totalorder %v733_v8, 10 }
  0x4a   :  { %v224_v50 = vsel %vm223_vm13, %v704_v53, %v222_v47  ;;  %vm225_vm2 = vcmp.eq.s32.totalorder %v637_v32, 24  ;;  %v261_v51 = vsel %vm260_vm14, %v578_v15, %v259_v49  ;;  %vm266_vm10 = vcmp.eq.s32.totalorder %v733_v8, 11 }
  0x4b   :  { %v157_v52 = vsel %vm154_vm12, %v772_v38, %v153_v45  ;;  %v800_v54 = vstv %s753_s29  ;;  %v263_v55 = vsel %vm262_vm15, %v585_v17, %v261_v51  ;;  %vm268_vm3 = vcmp.eq.s32.totalorder %v733_v8, 12 }
  0x4c   :  { %v805_v56 = vstv %s759_s30  ;;  %v265_v57 = vsel %vm264_vm1, %v592_v19, %v263_v55  ;;  %vm270_vm4 = vcmp.eq.s32.totalorder %v733_v8, 13  ;;  %v226_v59 = vsel %vm225_vm2, %v715_v58, %v224_v50 }
  0x4d   :  { %vm227_vm5 = vcmp.eq.s32.totalorder %v637_v32, 25  ;;  %v267_v60 = vsel %vm266_vm10, %v601_v21, %v265_v57  ;;  %vm272_vm12 = vcmp.eq.s32.totalorder %v733_v8, 14  ;;  %v816_v61 = vsel %vm158_vm0, %v800_v54, %v157_v52 }
  0x4e   :  { %v819_v62 = vstv %s774_s4  ;;  %v269_v3 = vsel %vm268_vm3, %v608_v23, %v267_v60  ;;  %vm274_vm6 = vcmp.eq.s32.totalorder %v733_v8, 15  ;;  %vm229_vm7 = vcmp.eq.s32.totalorder %v637_v32, 26 }
  0x4f   :  { %v271_v12 = vsel %vm270_vm4, %v613_v25, %v269_v3  ;;  %vm276_vm8 = vcmp.eq.s32.totalorder %v733_v8, 16  ;;  %vm278_vm9 = vcmp.eq.s32.totalorder %v733_v8, 17  ;;  %v228_v14 = vsel %vm227_vm5, %v725_v63, %v226_v59 }
  0x50   :  { %vm231_vm11 = vcmp.eq.s32.totalorder %v637_v32, 27  ;;  %v273_v16 = vsel %vm272_vm12, %v620_v27, %v271_v12  ;;  %vm280_vm13 = vcmp.eq.s32.totalorder %v733_v8, 18  ;;  %vm282_vm14 = vcmp.eq.s32.totalorder %v733_v8, 19 }
  0x51   :  { %v275_v18 = vsel %vm274_vm6, %v627_v29, %v273_v16  ;;  %vm284_vm15 = vcmp.eq.s32.totalorder %v733_v8, 20  ;;  %vm311_vm0 = vcmp.eq.s32.totalorder %v823_v5, 0  ;;  %vm313_vm1 = vcmp.eq.s32.totalorder %v823_v5, 1 }
  0x52   :  { %vm162_vm2 = vcmp.eq.s32.totalorder %v531_v0, 29  ;;  %v277_v20 = vsel %vm276_vm8, %v633_v31, %v275_v18  ;;  %vm286_vm10 = vcmp.eq.s32.totalorder %v733_v8, 21  ;;  %v312_v22 = vsel %vm311_vm0, %v537_v1, 0.0 }
  0x53   :  { %vm315_vm3 = vcmp.eq.s32.totalorder %v823_v5, 2  ;;  %v279_v24 = vsel %vm278_vm9, %v641_v34, %v277_v20  ;;  %v314_v26 = vsel %vm313_vm1, %v539_v2, %v312_v22  ;;  %vm317_vm4 = vcmp.eq.s32.totalorder %v823_v5, 3 }
  0x54   :  { %vm319_vm5 = vcmp.eq.s32.totalorder %v823_v5, 4  ;;  %v230_v28 = vsel %vm229_vm7, %v736_v10, %v228_v14  ;;  %v281_v30 = vsel %vm280_vm13, %v651_v36, %v279_v24  ;;  %v316_v1 = vsel %vm315_vm3, %v545_v4, %v314_v26 }
  0x55   :  { %vm321_vm12 = vcmp.eq.s32.totalorder %v823_v5, 5  ;;  %vm166_vm6 = vcmp.eq.s32.totalorder %v531_v0, 30  ;;  %v283_v2 = vsel %vm282_vm14, %v654_v37, %v281_v30  ;;  %vm288_vm8 = vcmp.eq.s32.totalorder %v733_v8, 22 }
  0x56   :  { %v318_v33 = vsel %vm317_vm4, %v551_v6, %v316_v1  ;;  %vm323_vm7 = vcmp.eq.s32.totalorder %v823_v5, 6  ;;  %v285_v35 = vsel %vm284_vm15, %v661_v39, %v283_v2  ;;  %vm290_vm9 = vcmp.eq.s32.totalorder %v733_v8, 23 }
  0x57   :  { %v320_v4 = vsel %vm319_vm5, %v554_v7, %v318_v33  ;;  %vm325_vm13 = vcmp.eq.s32.totalorder %v823_v5, 7  ;;  %v287_v40 = vsel %vm286_vm10, %v677_v43, %v285_v35  ;;  %vm292_vm14 = vcmp.eq.s32.totalorder %v733_v8, 24 }
  0x58   :  { %v322_v6 = vsel %vm321_vm12, %v560_v9, %v320_v4  ;;  %vm327_vm0 = vcmp.eq.s32.totalorder %v823_v5, 8  ;;  %v289_v41 = vsel %vm288_vm8, %v685_v46, %v287_v40  ;;  %vm294_vm15 = vcmp.eq.s32.totalorder %v733_v8, 25 }
  0x59   :  { %v324_v7 = vsel %vm323_vm7, %v566_v11, %v322_v6  ;;  %vm329_vm1 = vcmp.eq.s32.totalorder %v823_v5, 9  ;;  %v291_v42 = vsel %vm290_vm9, %v704_v53, %v289_v41  ;;  %vm296_vm10 = vcmp.eq.s32.totalorder %v733_v8, 26 }
  0x5a   :  { %v326_v44 = vsel %vm325_vm13, %v572_v13, %v324_v7  ;;  %vm331_vm3 = vcmp.eq.s32.totalorder %v823_v5, 10  ;;  %vm233_vm4 = vcmp.eq.s32.totalorder %v637_v32, 28  ;;  %v293_v9 = vsel %vm292_vm14, %v715_v58, %v291_v42 }
  0x5b   :  { %v328_v45 = vsel %vm327_vm0, %v578_v15, %v326_v44  ;;  %vm333_vm5 = vcmp.eq.s32.totalorder %v823_v5, 11  ;;  %v232_v11 = vsel %vm231_vm11, %v772_v38, %v230_v28  ;;  %v295_v47 = vsel %vm294_vm15, %v725_v63, %v293_v9 }
  0x5c   :  { %v330_v48 = vsel %vm329_vm1, %v585_v17, %v328_v45  ;;  %vm335_vm12 = vcmp.eq.s32.totalorder %v823_v5, 12  ;;  %v297_v13 = vsel %vm296_vm10, %v736_v10, %v295_v47  ;;  %vm298_vm8 = vcmp.eq.s32.totalorder %v733_v8, 27 }
  0x5d   :  { %v332_v49 = vsel %vm331_vm3, %v592_v19, %v330_v48  ;;  %vm337_vm7 = vcmp.eq.s32.totalorder %v823_v5, 13  ;;  %v165_v15 = vsel %vm162_vm2, %v805_v56, %v816_v61  ;;  %vm170_vm11 = vcmp.eq.s32.totalorder %v531_v0, 31 }
  0x5e   :  { %v334_v17 = vsel %vm333_vm5, %v601_v21, %v332_v49  ;;  %vm339_vm9 = vcmp.eq.s32.totalorder %v823_v5, 14  ;;  %v234_v50 = vsel %vm233_vm4, %v800_v54, %v232_v11  ;;  %vm235_vm13 = vcmp.eq.s32.totalorder %v637_v32, 29 }
  0x5f   :  { %v336_v19 = vsel %vm335_vm12, %v608_v23, %v334_v17  ;;  %vm341_vm14 = vcmp.eq.s32.totalorder %v823_v5, 15  ;;  %v299_v51 = vsel %vm298_vm8, %v772_v38, %v297_v13  ;;  %vm300_vm2 = vcmp.eq.s32.totalorder %v733_v8, 28 }
  0x60   :  { %v338_v52 = vsel %vm337_vm7, %v613_v25, %v336_v19  ;;  %vm343_vm0 = vcmp.eq.s32.totalorder %v823_v5, 16  ;;  %v169_v21 = vsel %vm166_vm6, %v819_v62, %v165_v15  ;;  %v172_v55 = vstv %s874_s0 }
  0x61   :  { %v340_v57 = vsel %vm339_vm9, %v620_v27, %v338_v52  ;;  %vm345_vm15 = vcmp.eq.s32.totalorder %v823_v5, 17  ;;  %v236_v23 = vsel %vm235_vm13, %v805_v56, %v234_v50  ;;  %vm237_vm1 = vcmp.eq.s32.totalorder %v637_v32, 30 }
  0x62   :  { %v342_v59 = vsel %vm341_vm14, %v627_v29, %v340_v57  ;;  %vm347_vm10 = vcmp.eq.s32.totalorder %v823_v5, 18  ;;  %v301_v25 = vsel %vm300_vm2, %v800_v54, %v299_v51  ;;  %vm302_vm3 = vcmp.eq.s32.totalorder %v733_v8, 29 }
  0x63   :  { %v344_v60 = vsel %vm343_vm0, %v633_v31, %v342_v59  ;;  %vm349_vm6 = vcmp.eq.s32.totalorder %v823_v5, 19  ;;  %v44_v27 = vstv %s980_s2  ;;  %v173_v61 = vsel %vm170_vm11, %v172_v55, %v169_v21  ;;  %s495_s2 = smov [#allocation8]  }
  0x64   :  { %v346_v3 = vsel %vm345_vm15, %v641_v34, %v344_v60  ;;  %vm351_vm4 = vcmp.eq.s32.totalorder %v823_v5, 20  ;;  %v238_v29 = vsel %vm237_vm1, %v819_v62, %v236_v23  ;;  %vm239_vm5 = vcmp.eq.s32.totalorder %v637_v32, 31  ;;  %s383_s7 = sshll.u32 %s495_s2, 4  ;;  %s384_s7 = int_to_ptr.vmem [resolvable:$true] %s383_s7 }
  0x65   :  { %v348_v12 = vsel %vm347_vm10, %v651_v36, %v346_v3  ;;  %vm353_vm12 = vcmp.eq.s32.totalorder %v823_v5, 21  ;;  %v303_v31 = vsel %vm302_vm3, %v805_v56, %v301_v25  ;;  %vm304_vm8 = vcmp.eq.s32.totalorder %v733_v8, 30  ;;  %s463_s8 = scalar_lea.vmem %s384_s7, 128  ;;  %p468_p0 = scmp.lt.s32.totalorder %s384_s7, %s384_s7 }
  0x66   :  { %v350_v14 = vsel %vm349_vm6, %v654_v37, %v348_v12  ;;  %vm355_vm7 = vcmp.eq.s32.totalorder %v823_v5, 22  ;;  %v174_v0 = vadd.f32 %v173_v61, %v44_v27  ;;  %vm357_vm11 = vcmp.eq.s32.totalorder %v823_v5, 23  ;;  %p464_p13 = scmp.ne.s32.totalorder %s384_s7, %s463_s8  ;;  %p469_p1 = scmp.lt.s32.totalorder %s463_s8, %s463_s8 }
  0x67   :  { %v352_v34 = vsel %vm351_vm4, %v661_v39, %v350_v14  ;;  %v240_v16 = vsel %vm239_vm5, %v172_v55, %v238_v29  ;;  %vm359_vm9 = vcmp.eq.s32.totalorder %v823_v5, 24  ;;  %v305_v36 = vsel %vm304_vm8, %v819_v62, %v303_v31 }
  0x68   :  { %v354_v32 = vsel %vm353_vm12, %v677_v43, %v352_v34  ;;  %vm306_vm13 = vcmp.eq.s32.totalorder %v733_v8, 31  ;;  %vm361_vm14 = vcmp.eq.s32.totalorder %v823_v5, 25  ;;  %vm363_vm2 = vcmp.eq.s32.totalorder %v823_v5, 26  ;;  %p470_p2 = por %p469_p1, %p468_p0 }
  0x69   :  { %v356_v18 = vsel %vm355_vm7, %v685_v46, %v354_v32  ;;  %v241_v39 = vadd.f32 %v240_v16, %v174_v0  ;;  %vm365_vm0 = vcmp.eq.s32.totalorder %v823_v5, 27  ;;  %v307_v43 = vsel %vm306_vm13, %v172_v55, %v305_v36 }
  0x6a   :  { %v358_v37 = vsel %vm357_vm11, %v704_v53, %v356_v18  ;;  %vm367_vm15 = vcmp.eq.s32.totalorder %v823_v5, 28  ;;  %vm369_vm1 = vcmp.eq.s32.totalorder %v823_v5, 29  ;;  %vm371_vm10 = vcmp.eq.s32.totalorder %v823_v5, 30  ;;  %p471_p3 = pnand %p470_p2, %p464_p13 }
  0x6b   :  { %v360_v20 = vsel %vm359_vm9, %v715_v58, %v358_v37  ;;  %v308_v53 = vadd.f32 %v307_v43, %v241_v39  ;;  %vm373_vm3 = vcmp.eq.s32.totalorder %v823_v5, 31 }
  0x6c   :  { %v362_v22 = vsel %vm361_vm14, %v725_v63, %v360_v20 }
  0x6d   :  { %v364_v8 = vsel %vm363_vm2, %v736_v10, %v362_v22 }
  0x6e   :  { %v366_v46 = vsel %vm365_vm0, %v772_v38, %v364_v8 }
  0x6f   :  { %v368_v24 = vsel %vm367_vm15, %v800_v54, %v366_v46 }
  0x70   :  { %v370_v58 = vsel %vm369_vm1, %v805_v56, %v368_v24 }
  0x71   :  { %v372_v63 = vsel %vm371_vm10, %v819_v62, %v370_v58 }
  0x72   :  { %v374_v26 = vsel %vm373_vm3, %v172_v55, %v372_v63 }
  0x73   :  { %v375_v28 = vadd.f32 %v374_v26, %v308_v53 }
  0x75   :  { %376 = vst [vmem:[#allocation8] sm:$0xff] %v375_v28 }
  0x76   :  { %474 = shalt.err (!%p471_p3)
}
  0x77   :  { %s475_s11 = scalar_lea.hbm %s981_s3, 128 }
  0x78   :  { %p476_p4 = scmp.ne.s32.totalorder %s981_s3, %s475_s11  ;;  %p479_p5 = scmp.lt.u32.totalorder %s475_s11, %s981_s3 }
  0x7a   :  { %p481_p6 = pnand %p479_p5, %p476_p4 }
  0x7c   :  { %484 = shalt.err (!%p481_p6)
}
  0x7d   :  { %386 = dma.vmem_to_hbm [thread:$0]  %s384_s7, 128, %s981_s3, [#allocation5]  }
  0x7e   :  { %489 = dma.done.wait [#allocation5], 128  }
  0x7f   :  { %490 = vsyncadd [#allocation5], 4294967168 }
  0x80   :  { %390 = vsyncpa [#allocation4], 1 }
  0x81   :  { %391 = vsyncpa [#allocation5], 1 }
  0x82   :  { %392 = vsyncpa [#allocation6], 1 }

</bundles_post_ra>
